<compile_context>
chip_gen: v5e
topology: v5e:2x2
jax: 0.10.0
libtpu: 0.0.40
codegen_flags: <defaults>
</compile_context>

<pallas_src>
import math

import jax
import jax.numpy as jnp
from jax.experimental import pallas as pl
from jax.experimental.pallas import tpu as pltpu

LANE = 128                        # lane-dense hidden-feature width (vreg lanes)
BIAS_ROWS = 8                     # each bias padded to one (8, LANE) sublane tile
LAYER_STRIDE = LANE + BIAS_ROWS   # rows per layer in the packed slab


def _round_up(x, m):
    return pl.cdiv(x, m) * m


def _make_mlp_kernel(num_layers, in_rows, out_d):
    """Kernel over one (block_b, in_rows) batch tile; whole MLP in one body."""

    def kernel(x_ref, slab_ref, o_ref):
        h = x_ref[...]                                             # (Bt, in_rows) f32
        for l in range(num_layers):                                # unrolled at trace time
            base = l * LAYER_STRIDE
            k = in_rows if l == 0 else LANE                        # real K for layer 0
            w = slab_ref[base:base + k, :]                         # (k, LANE), 8-aligned rows
            b_blk = slab_ref[base + LANE:base + LANE + BIAS_ROWS, :]   # aligned (8, LANE) read
            b = b_blk[0:1, :]                                      # (1, LANE)
            h = jnp.dot(h, w, preferred_element_type=jnp.float32) + b
            if l < num_layers - 1:                                 # hidden layers only
                h = jnp.tanh(h)
        # store only the real output columns (masked vst on a (Bt, out_d) block)
        o_ref[...] = h[:, :out_d].astype(o_ref.dtype)

    return kernel


def pack_params(params):
    """Pack all (W, b) into one lane-dense f32 slab of shape
    (num_layers * (LANE + BIAS_ROWS), LANE).

    Weights are stored (fan_in, fan_out) (transposed from nn.Linear.weight) and
    zero-padded to (LANE, LANE); biases go in row 0 of an (8, LANE) block."""
    blocks = []
    for w, b in params:
        fan_in, fan_out = w.shape
        assert fan_in <= LANE and fan_out <= LANE, "feature dims must be <= 128"
        wp = jnp.zeros((LANE, LANE), jnp.float32).at[:fan_in, :fan_out].set(
            w.astype(jnp.float32))
        bp = jnp.zeros((BIAS_ROWS, LANE), jnp.float32).at[0, :fan_out].set(
            b.reshape(-1).astype(jnp.float32))
        blocks += [wp, bp]
    return jnp.concatenate(blocks, axis=0)


def _auto_block_b(B):
    """Small populations -> one tile (no pipeline steps); large -> 1024-row tiles."""
    b8 = _round_up(B, 8)
    return b8 if b8 <= 1024 else 1024


def small_fc_fw_forward_batched(xb, params, *, block_b=None):
    """Batched forward: xb is (B, in_d) (population / env batch stacked into B).
    Each row gets exactly the module's forward(). Returns (B, out_d)."""
    B, in_d = xb.shape
    num_layers = len(params)
    out_d = params[-1][0].shape[1]

    if block_b is None:
        block_b = _auto_block_b(B)
    block_b = _round_up(block_b, 8)
    B_pad = _round_up(B, block_b)
    in_rows = _round_up(in_d, 8)          # keep the slab K-slice sublane-aligned

    xb = xb.astype(jnp.float32)
    if (B_pad != B) or (in_rows != in_d):
        x_in = jnp.zeros((B_pad, in_rows), jnp.float32).at[:B, :in_d].set(xb)
    else:
        x_in = xb                         # no host-side pad pass in the common case

    slab = pack_params(params)            # (num_layers * 136, 128) f32, ~272 KiB

    # Advisory cost hint (real work only).
    mm_flops = 2 * B_pad * (in_rows * LANE + (num_layers - 1) * LANE * LANE)
    bytes_accessed = (x_in.size + slab.size + B_pad * out_d) * 4
    cost = pl.CostEstimate(flops=mm_flops,
                           transcendentals=(num_layers - 1) * B_pad * LANE,
                           bytes_accessed=bytes_accessed)

    # Only raise the scoped-VMEM limit when the tiles actually need it
    # (v5e default 16 MiB; v6e/v7x 32 MiB; v7x physical cap 64 MiB).
    tile_bytes = (2 * block_b * in_rows          # double-buffered x tiles
                  + 2 * block_b * out_d          # double-buffered out tiles
                  + 2 * slab.size                # slab (conservatively x2)
                  + 4 * block_b * LANE) * 4      # headroom for live activations
    vmem_limit = None
    if tile_bytes > 16 * 1024 * 1024:
        vmem_limit = min(2 * tile_bytes, 60 * 1024 * 1024)   # stay under v7x physical

    out = pl.pallas_call(
        _make_mlp_kernel(num_layers, in_rows, out_d),
        out_shape=jax.ShapeDtypeStruct((B_pad, out_d), jnp.float32),
        grid=(B_pad // block_b,),
        in_specs=[
            # batch tile: marches over B; last dim == full array dim (legal, no 128 pad)
            pl.BlockSpec((block_b, in_rows), lambda i: (i, 0)),
            # packed weights: constant block index -> DMA'd once, VMEM-resident
            pl.BlockSpec(slab.shape, lambda i: (0, 0)),
        ],
        # real out_d columns only (masked stores, tiny writeback)
        out_specs=pl.BlockSpec((block_b, out_d), lambda i: (i, 0)),
        compiler_params=pltpu.CompilerParams(
            dimension_semantics=("parallel",),    # v7x: shard batch tiles across 2 TCs
            vmem_limit_bytes=vmem_limit),
        cost_estimate=cost,
    )(x_in, slab)

    return out[:B] if B_pad != B else out


def small_fc_fw_forward(x, params):
    """Module-equivalent single-sample forward: x is the 1-D input 'list'.
    Returns (1, out_d), matching torch forward(x).  Routed through plain jnp:
    a (1, in_d) MLP is far below pallas launch + DMA cost."""
    out = jnp.asarray(x, jnp.float32).reshape(1, -1)
    for w, b in params[:-1]:
        out = jnp.tanh(out @ w + b[None, :])
    w, b = params[-1]
    return out @ w + b[None, :]


def init_params(key, in_d, out_d, num_hidden=3, hidden_dim=10):
    """Deterministic init mimicking torch.nn.Linear default:
    U(-1/sqrt(fan_in), 1/sqrt(fan_in)).  Weights stored transposed (fan_in, fan_out)."""
    dims = [in_d] + [hidden_dim] * num_hidden + [out_d]
    params = []
    for fan_in, fan_out in zip(dims[:-1], dims[1:]):
        key, kw, kb = jax.random.split(key, 3)
        bound = 1.0 / math.sqrt(fan_in)
        w = jax.random.uniform(kw, (fan_in, fan_out), jnp.float32, -bound, bound)
        b = jax.random.uniform(kb, (fan_out,), jnp.float32, -bound, bound)
        params.append((w, b))
    return params


def reference_forward_batched(xb, params):
    out = xb.astype(jnp.float32)
    for w, b in params[:-1]:
        out = jnp.tanh(out @ w + b[None, :])
    w, b = params[-1]
    return out @ w + b[None, :]


# TODO(synk): Agent bookkeeping (fitness/novelty stats, get/set_flattened_weights,
# numpy conversion) is host-side state management with no kernel equivalent.

if __name__ == "__main__":
    in_d, out_d, num_hidden, hidden_dim = 16, 4, 3, 32
    B = 512   # population / env batch stacked into the M dimension

    key = jax.random.PRNGKey(0)
    key, kx = jax.random.split(key)
    xb = jax.random.normal(kx, (B, in_d), jnp.float32)

    params = init_params(key, in_d, out_d, num_hidden, hidden_dim)

    # Batched (population) forward: auto block_b=512 -> grid=1, weights DMA'd once,
    # no input padding, out_d-wide writeback.
    out_b = jax.block_until_ready(small_fc_fw_forward_batched(xb, params))
    ref_b = reference_forward_batched(xb, params)
    assert out_b.shape == (B, out_d), out_b.shape
    assert jnp.allclose(out_b, ref_b, atol=1e-4, rtol=1e-4), (out_b[:2], ref_b[:2])

    # Also exercise the multi-tile path (grid > 1) to check the BlockSpec marching.
    out_t = jax.block_until_ready(
        small_fc_fw_forward_batched(xb, params, block_b=128))
    assert jnp.allclose(out_t, ref_b, atol=1e-4, rtol=1e-4)

    # Module-equivalent single-sample forward (x 'list' -> (1, out_d)).
    out_1 = jax.block_until_ready(small_fc_fw_forward(xb[0], params))
    assert out_1.shape == (1, out_d), out_1.shape
    assert jnp.allclose(out_1, ref_b[0:1], atol=1e-4, rtol=1e-4), (out_1, ref_b[0:1])

    print("KERNEL_OK")
</pallas_src>

<mosaic_0001>
module attributes {stable_mosaic.version = 11 : i64} {
  func.func @kernel(%arg0: i32, %arg1: memref<512x16xf32, #tpu.memory_space<vmem>>, %arg2: memref<544x128xf32, #tpu.memory_space<vmem>>, %arg3: memref<512x4xf32, #tpu.memory_space<vmem>>) attributes {dimension_semantics = [#tpu.dimension_semantics<parallel>], iteration_bounds = array<i64: 1>, scalar_prefetch = 0 : i64, scratch_operands = 0 : i64, tpu.core_type = #tpu.core_type<tc>, window_params = [{transform_indices = @transform_0, window_bounds = array<i64: 512, 16>}, {pipeline_mode = #tpu.pipeline_mode<synchronous>, transform_indices = @transform_1, window_bounds = array<i64: 544, 128>}, {transform_indices = @transform_2, window_bounds = array<i64: 512, 4>}]} {
    %c0 = arith.constant 0 : index
    %c0_0 = arith.constant 0 : index
    %0 = vector.load %arg1[%c0, %c0_0] : memref<512x16xf32, #tpu.memory_space<vmem>>, vector<512x16xf32>
    %c0_1 = arith.constant 0 : index
    %c0_2 = arith.constant 0 : index
    %1 = vector.load %arg2[%c0_1, %c0_2] : memref<544x128xf32, #tpu.memory_space<vmem>>, vector<16x128xf32>
    %c128 = arith.constant 128 : index
    %c0_3 = arith.constant 0 : index
    %2 = vector.load %arg2[%c128, %c0_3] : memref<544x128xf32, #tpu.memory_space<vmem>>, vector<8x128xf32>
    %3 = vector.extract_strided_slice %2 {offsets = [0, 0], sizes = [1, 128], strides = [1, 1]} : vector<8x128xf32> to vector<1x128xf32>
    %cst = arith.constant dense<0.000000e+00> : vector<512x128xf32>
    %4 = tpu.matmul %0, %1, %cst {dimension_numbers = #tpu.dot_dimension_numbers<[1], [0], [0], [1], [0, 0, 1, 1], [], []>} : vector<512x16xf32>, vector<16x128xf32>, vector<512x128xf32> -> vector<512x128xf32>
    %5 = vector.broadcast %3 : vector<1x128xf32> to vector<512x128xf32>
    %6 = arith.addf %4, %5 : vector<512x128xf32>
    %7 = math.tanh %6 : vector<512x128xf32>
    %c136 = arith.constant 136 : index
    %c0_4 = arith.constant 0 : index
    %8 = vector.load %arg2[%c136, %c0_4] : memref<544x128xf32, #tpu.memory_space<vmem>>, vector<128x128xf32>
    %c264 = arith.constant 264 : index
    %c0_5 = arith.constant 0 : index
    %9 = vector.load %arg2[%c264, %c0_5] : memref<544x128xf32, #tpu.memory_space<vmem>>, vector<8x128xf32>
    %10 = vector.extract_strided_slice %9 {offsets = [0, 0], sizes = [1, 128], strides = [1, 1]} : vector<8x128xf32> to vector<1x128xf32>
    %cst_6 = arith.constant dense<0.000000e+00> : vector<512x128xf32>
    %11 = tpu.matmul %7, %8, %cst_6 {dimension_numbers = #tpu.dot_dimension_numbers<[1], [0], [0], [1], [0, 0, 1, 1], [], []>} : vector<512x128xf32>, vector<128x128xf32>, vector<512x128xf32> -> vector<512x128xf32>
    %12 = vector.broadcast %10 : vector<1x128xf32> to vector<512x128xf32>
    %13 = arith.addf %11, %12 : vector<512x128xf32>
    %14 = math.tanh %13 : vector<512x128xf32>
    %c272 = arith.constant 272 : index
    %c0_7 = arith.constant 0 : index
    %15 = vector.load %arg2[%c272, %c0_7] : memref<544x128xf32, #tpu.memory_space<vmem>>, vector<128x128xf32>
    %c400 = arith.constant 400 : index
    %c0_8 = arith.constant 0 : index
    %16 = vector.load %arg2[%c400, %c0_8] : memref<544x128xf32, #tpu.memory_space<vmem>>, vector<8x128xf32>
    %17 = vector.extract_strided_slice %16 {offsets = [0, 0], sizes = [1, 128], strides = [1, 1]} : vector<8x128xf32> to vector<1x128xf32>
    %cst_9 = arith.constant dense<0.000000e+00> : vector<512x128xf32>
    %18 = tpu.matmul %14, %15, %cst_9 {dimension_numbers = #tpu.dot_dimension_numbers<[1], [0], [0], [1], [0, 0, 1, 1], [], []>} : vector<512x128xf32>, vector<128x128xf32>, vector<512x128xf32> -> vector<512x128xf32>
    %19 = vector.broadcast %17 : vector<1x128xf32> to vector<512x128xf32>
    %20 = arith.addf %18, %19 : vector<512x128xf32>
    %21 = math.tanh %20 : vector<512x128xf32>
    %c408 = arith.constant 408 : index
    %c0_10 = arith.constant 0 : index
    %22 = vector.load %arg2[%c408, %c0_10] : memref<544x128xf32, #tpu.memory_space<vmem>>, vector<128x128xf32>
    %c536 = arith.constant 536 : index
    %c0_11 = arith.constant 0 : index
    %23 = vector.load %arg2[%c536, %c0_11] : memref<544x128xf32, #tpu.memory_space<vmem>>, vector<8x128xf32>
    %24 = vector.extract_strided_slice %23 {offsets = [0, 0], sizes = [1, 128], strides = [1, 1]} : vector<8x128xf32> to vector<1x128xf32>
    %cst_12 = arith.constant dense<0.000000e+00> : vector<512x128xf32>
    %25 = tpu.matmul %21, %22, %cst_12 {dimension_numbers = #tpu.dot_dimension_numbers<[1], [0], [0], [1], [0, 0, 1, 1], [], []>} : vector<512x128xf32>, vector<128x128xf32>, vector<512x128xf32> -> vector<512x128xf32>
    %26 = vector.broadcast %24 : vector<1x128xf32> to vector<512x128xf32>
    %27 = arith.addf %25, %26 : vector<512x128xf32>
    %28 = vector.extract_strided_slice %27 {offsets = [0, 0], sizes = [512, 4], strides = [1, 1]} : vector<512x128xf32> to vector<512x4xf32>
    %c0_13 = arith.constant 0 : index
    %c0_14 = arith.constant 0 : index
    %29 = vector.load %arg3[%c0_13, %c0_14] : memref<512x4xf32, #tpu.memory_space<vmem>>, vector<512x4xf32>
    tpu.vector_store %arg3[%c0_13, %c0_14], %28 {strides = array<i32>} : memref<512x4xf32, #tpu.memory_space<vmem>>, vector<512x4xf32>,
    return
  }
  func.func @transform_0(%arg0: i32) -> (i32, i32) {
    %c0_i32 = arith.constant 0 : i32
    %c0_i32_0 = arith.constant 0 : i32
    return %arg0, %c0_i32 : i32, i32
  }
  func.func @transform_1(%arg0: i32) -> (i32, i32) {
    %c0_i32 = arith.constant 0 : i32
    %c0_i32_0 = arith.constant 0 : i32
    %c0_i32_1 = arith.constant 0 : i32
    return %c0_i32, %c0_i32_0 : i32, i32
  }
  func.func @transform_2(%arg0: i32) -> (i32, i32) {
    %c0_i32 = arith.constant 0 : i32
    %c0_i32_0 = arith.constant 0 : i32
    return %arg0, %c0_i32 : i32, i32
  }
}

</mosaic_0001>

<bundles_post_ra>
// kernel: tpu_custom_call.1
= control target key start
LH: loop header
LB: loop body
LE: loop exit
PB: predicated region body
PF: predicated region fallthrough
CT: control target
= control target key end

     0   :  { %vm79_vm0 = vcmask 130048   ;;  %vm1354_vm1 = vcmask 31744   ;;  %s2824_s1 = inlined_call_operand.vmem [shape: f32[544,128], index: 1, kind: input, shape index: {}]   ;;  %s2825_s0 = inlined_call_operand.vmem [shape: f32[512,16], index: 0, kind: input, shape index: {}]   ;;  %s2826_s2 = inlined_call_operand.vmem [shape: f32[512,4], index: 2, kind: output, shape index: {}]  }
   0x1   :  { %v76_v0 = vld [vmem:[%s2824_s1 + $0x8] sm:$0xff]  ;;  %v75_v1 = vld [vmem:[%s2824_s1] sm:$0xff]  ;;  %v13_v4 = vld [vmem:[%s2825_s0 + $0x10] sm:$0xff] }
   0x2   :  { %286 = vmatpush.msra.mxu0 %v76_v0  ;;  %v11_v2 = vld [vmem:[%s2825_s0] sm:$0xff]  ;;  %v12_v3 = vld [vmem:[%s2825_s0 + $0x8] sm:$0xff]  ;;  %v14_v5 = vld [vmem:[%s2825_s0 + $0x18] sm:$0xff] }
   0x3   :  { %v15_v6 = vld [vmem:[%s2825_s0 + $0x20] sm:$0xff]  ;;  %v16_v7 = vld [vmem:[%s2825_s0 + $0x28] sm:$0xff]  ;;  %v17_v8 = vld [vmem:[%s2825_s0 + $0x30] sm:$0xff] }
   0x4   :  { %287 = vmatpush.msra.mxu0 %v75_v1  ;;  %v18_v9 = vld [vmem:[%s2825_s0 + $0x38] sm:$0xff]  ;;  %v19_v10 = vld [vmem:[%s2825_s0 + $0x40] sm:$0xff]  ;;  %v20_v11 = vld [vmem:[%s2825_s0 + $0x48] sm:$0xff] }
   0x5   :  { %1423 = vmatmul.msk.f32.vlgmr.msra.gmra.mxu0 %vm79_vm0, %v11_v2  ;;  %v560_v12 = vld [vmem:[%s2824_s1 + $0x100] sm:$0xff]  ;;  %v559_v13 = vld [vmem:[%s2824_s1 + $0xf8] sm:$0xff]  ;;  %v558_v14 = vld [vmem:[%s2824_s1 + $0xf0] sm:$0xff] }
   0x6   :  { %563 = vmatpush.msra.mxu1 %v560_v12  ;;  %v557_v15 = vld [vmem:[%s2824_s1 + $0xe8] sm:$0xff]  ;;  %v21_v16 = vld [vmem:[%s2825_s0 + $0x50] sm:$0xff]  ;;  %v556_v17 = vld [vmem:[%s2824_s1 + $0xe0] sm:$0xff] }
   0x7   :  { %v555_v18 = vld [vmem:[%s2824_s1 + $0xd8] sm:$0xff]  ;;  %v554_v19 = vld [vmem:[%s2824_s1 + $0xd0] sm:$0xff]  ;;  %v553_v20 = vld [vmem:[%s2824_s1 + $0xc8] sm:$0xff] }
   0x8   :  { %564 = vmatpush.msra.mxu1 %v559_v13  ;;  %v22_v21 = vld [vmem:[%s2825_s0 + $0x58] sm:$0xff]  ;;  %v552_v22 = vld [vmem:[%s2824_s1 + $0xc0] sm:$0xff]  ;;  %v550_v24 = vld [vmem:[%s2824_s1 + $0xb0] sm:$0xff] }
   0x9   :  { %v551_v23 = vld [vmem:[%s2824_s1 + $0xb8] sm:$0xff]  ;;  %v23_v25 = vld [vmem:[%s2825_s0 + $0x60] sm:$0xff]  ;;  %v549_v26 = vld [vmem:[%s2824_s1 + $0xa8] sm:$0xff] }
   0xa   :  { %565 = vmatpush.msra.mxu1 %v558_v14  ;;  %v548_v27 = vld [vmem:[%s2824_s1 + $0xa0] sm:$0xff]  ;;  %v547_v28 = vld [vmem:[%s2824_s1 + $0x98] sm:$0xff]  ;;  %v546_v29 = vld [vmem:[%s2824_s1 + $0x90] sm:$0xff] }
   0xb   :  { %v24_v30 = vld [vmem:[%s2825_s0 + $0x68] sm:$0xff]  ;;  %v25_v32 = vld [vmem:[%s2825_s0 + $0x70] sm:$0xff]  ;;  %v26_v33 = vld [vmem:[%s2825_s0 + $0x78] sm:$0xff] }
   0xc   :  { %566 = vmatpush.msra.mxu1 %v557_v15  ;;  %v545_v31 = vld [vmem:[%s2824_s1 + $0x88] sm:$0xff]  ;;  %v77_v34 = vld [vmem:[%s2824_s1 + $0x80] sm:$0xff]  ;;  %v29_v44 = vld [vmem:[%s2825_s0 + $0x90] sm:$0xff] }
   0xd   :  { %1424 = vmatmul.msk.f32.gmra.mxu0 %vm79_vm0, %v12_v3  ;;  %v2007_v35 = vperm.slane %v77_v34, 0  ;;  %v27_v37 = vld [vmem:[%s2825_s0 + $0x80] sm:$0xff]  ;;  %v28_v40 = vld [vmem:[%s2825_s0 + $0x88] sm:$0xff]  ;;  %v30_v48 = vld [vmem:[%s2825_s0 + $0x98] sm:$0xff] }
   0xe   :  { %567 = vmatpush.msra.mxu1 %v556_v17  ;;  %v31_v52 = vld [vmem:[%s2825_s0 + $0xa0] sm:$0xff]  ;;  %v32_v56 = vld [vmem:[%s2825_s0 + $0xa8] sm:$0xff]  ;;  %v33_v60 = vld [vmem:[%s2825_s0 + $0xb0] sm:$0xff] }
   0xf   :  { %v34_v0 = vld [vmem:[%s2825_s0 + $0xb8] sm:$0xff]  ;;  %v37_v12 = vld [vmem:[%s2825_s0 + $0xd0] sm:$0xff]  ;;  %v851_v15 = vld [vmem:[%s2824_s1 + $0x188] sm:$0xff] }
  0x10   :  { %568 = vmatpush.msra.mxu1 %v555_v18  ;;  %854 = vmatpush.msra.mxu2 %v851_v15  ;;  %v849_v17 = vld [vmem:[%s2824_s1 + $0x178] sm:$0xff]  ;;  %v848_v18 = vld [vmem:[%s2824_s1 + $0x170] sm:$0xff] }
  0x11   :  { %v840_v34 = vld [vmem:[%s2824_s1 + $0x130] sm:$0xff] }
  0x12   :  { %569 = vmatpush.msra.mxu1 %v554_v19 }
  0x14   :  { %570 = vmatpush.msra.mxu1 %v553_v20  ;;  %v38_v20 = vld [vmem:[%s2825_s0 + $0xd8] sm:$0xff] }
  0x15   :  { %1425 = vmatmul.msk.f32.gmra.mxu0 %vm79_vm0, %v13_v4  ;;  %v35_v4 = vld [vmem:[%s2825_s0 + $0xc0] sm:$0xff] }
  0x16   :  { %571 = vmatpush.msra.mxu1 %v552_v22 }
  0x18   :  { %572 = vmatpush.msra.mxu1 %v551_v23  ;;  %v847_v23 = vld [vmem:[%s2824_s1 + $0x168] sm:$0xff] }
  0x1a   :  { %573 = vmatpush.msra.mxu1 %v550_v24  ;;  %v846_v24 = vld [vmem:[%s2824_s1 + $0x160] sm:$0xff] }
  0x1c   :  { %574 = vmatpush.msra.mxu1 %v549_v26  ;;  %v844_v26 = vld [vmem:[%s2824_s1 + $0x150] sm:$0xff] }
  0x1d   :  { %1426 = vmatmul.msk.f32.gmra.mxu0 %vm79_vm0, %v14_v5 }
  0x1e   :  { %575 = vmatpush.msra.mxu1 %v548_v27 }
  0x20   :  { %576 = vmatpush.msra.mxu1 %v547_v28  ;;  %v39_v28 = vld [vmem:[%s2825_s0 + $0xe0] sm:$0xff] }
  0x22   :  { %577 = vmatpush.msra.mxu1 %v546_v29 }
  0x24   :  { %578 = vmatpush.msra.mxu1 %v545_v31  ;;  %v843_v31 = vld [vmem:[%s2824_s1 + $0x148] sm:$0xff] }
  0x25   :  { %1427 = vmatmul.msk.f32.gmra.mxu0 %vm79_vm0, %v15_v6 }
  0x2d   :  { %1428 = vmatmul.msk.f32.gmra.mxu0 %vm79_vm0, %v16_v7 }
  0x35   :  { %1429 = vmatmul.msk.f32.gmra.mxu0 %vm79_vm0, %v17_v8  ;;  %v36_v8 = vld [vmem:[%s2825_s0 + $0xc8] sm:$0xff] }
  0x3d   :  { %1430 = vmatmul.msk.f32.gmra.mxu0 %vm79_vm0, %v18_v9 }
  0x45   :  { %1431 = vmatmul.msk.f32.gmra.mxu0 %vm79_vm0, %v19_v10 }
  0x4d   :  { %1432 = vmatmul.msk.f32.gmra.mxu0 %vm79_vm0, %v20_v11 }
  0x55   :  { %1433 = vmatmul.msk.f32.gmra.mxu0 %vm79_vm0, %v21_v16  ;;  %v850_v16 = vld [vmem:[%s2824_s1 + $0x180] sm:$0xff] }
  0x56   :  { %855 = vmatpush.msra.mxu2 %v850_v16 }
  0x58   :  { %856 = vmatpush.msra.mxu2 %v849_v17 }
  0x5a   :  { %857 = vmatpush.msra.mxu2 %v848_v18  ;;  %v47_v18 = vld [vmem:[%s2825_s0 + $0x120] sm:$0xff] }
  0x5c   :  { %858 = vmatpush.msra.mxu2 %v847_v23 }
  0x5d   :  { %1434 = vmatmul.msk.f32.gmra.mxu0 %vm79_vm0, %v22_v21 }
  0x5e   :  { %859 = vmatpush.msra.mxu2 %v846_v24 }
  0x65   :  { %1435 = vmatmul.msk.f32.gmra.mxu0 %vm79_vm0, %v23_v25  ;;  %v845_v25 = vld [vmem:[%s2824_s1 + $0x158] sm:$0xff] }
  0x66   :  { %860 = vmatpush.msra.mxu2 %v845_v25  ;;  %v48_v25 = vld [vmem:[%s2825_s0 + $0x128] sm:$0xff] }
  0x68   :  { %861 = vmatpush.msra.mxu2 %v844_v26 }
  0x6a   :  { %862 = vmatpush.msra.mxu2 %v843_v31 }
  0x6d   :  { %1436 = vmatmul.msk.f32.gmra.mxu0 %vm79_vm0, %v24_v30 }
  0x75   :  { %1437 = vmatmul.msk.f32.gmra.mxu0 %vm79_vm0, %v25_v32  ;;  %v842_v32 = vld [vmem:[%s2824_s1 + $0x140] sm:$0xff] }
  0x76   :  { %863 = vmatpush.msra.mxu2 %v842_v32  ;;  %v49_v32 = vld [vmem:[%s2825_s0 + $0x130] sm:$0xff] }
  0x7d   :  { %1438 = vmatmul.msk.f32.gmra.mxu0 %vm79_vm0, %v26_v33  ;;  %v841_v33 = vld [vmem:[%s2824_s1 + $0x138] sm:$0xff] }
  0x7e   :  { %864 = vmatpush.msra.mxu2 %v841_v33 }
  0x80   :  { %865 = vmatpush.msra.mxu2 %v840_v34 }
  0x82   :  { %v289_v36 = vpop.f32.mrf.mxu0 }
  0x83   :  { %v290_v38 = vadd.f32 %v289_v36, %v2007_v35 }
  0x85   :  { %1487 = vtanh.f32 %v290_v38  ;;  %1439 = vmatmul.msk.f32.gmra.mxu0 %vm79_vm0, %v27_v37  ;;  %v40_v37 = vld [vmem:[%s2825_s0 + $0xe8] sm:$0xff] }
  0x8a   :  { %v292_v39 = vpop.f32.mrf.mxu0 }
  0x8b   :  { %v1488_v41 = vpop.eup %1487  ;;  %v293_v42 = vadd.f32 %v292_v39, %v2007_v35 }
  0x8c   :  { %579 = vmatmul.f32.vlgmr.msra.gmra.mxu1 %v1488_v41  ;;  %v838_v41 = vld [vmem:[%s2824_s1 + $0x120] sm:$0xff] }
  0x8d   :  { %1489 = vtanh.f32 %v293_v42  ;;  %1440 = vmatmul.msk.f32.gmra.mxu0 %vm79_vm0, %v28_v40  ;;  %v839_v40 = vld [vmem:[%s2824_s1 + $0x128] sm:$0xff]  ;;  %v837_v42 = vld [vmem:[%s2824_s1 + $0x118] sm:$0xff] }
  0x8e   :  { %866 = vmatpush.msra.mxu2 %v839_v40  ;;  %v50_v40 = vld [vmem:[%s2825_s0 + $0x138] sm:$0xff] }
  0x90   :  { %867 = vmatpush.msra.mxu2 %v838_v41 }
  0x92   :  { %v295_v43 = vpop.f32.mrf.mxu0  ;;  %868 = vmatpush.msra.mxu2 %v837_v42 }
  0x93   :  { %v1490_v45 = vpop.eup %1489  ;;  %v296_v46 = vadd.f32 %v295_v43, %v2007_v35  ;;  %v836_v43 = vld [vmem:[%s2824_s1 + $0x110] sm:$0xff] }
  0x94   :  { %582 = vmatmul.f32.gmra.mxu1 %v1490_v45  ;;  %v41_v45 = vld [vmem:[%s2825_s0 + $0xf0] sm:$0xff]  ;;  %869 = vmatpush.msra.mxu2 %v836_v43 }
  0x95   :  { %1491 = vtanh.f32 %v296_v46  ;;  %1441 = vmatmul.msk.f32.gmra.mxu0 %vm79_vm0, %v29_v44 }
  0x9a   :  { %v298_v47 = vpop.f32.mrf.mxu0 }
  0x9b   :  { %v1492_v49 = vpop.eup %1491  ;;  %v299_v50 = vadd.f32 %v298_v47, %v2007_v35 }
  0x9c   :  { %585 = vmatmul.f32.gmra.mxu1 %v1492_v49  ;;  %v42_v49 = vld [vmem:[%s2825_s0 + $0xf8] sm:$0xff] }
  0x9d   :  { %1493 = vtanh.f32 %v299_v50  ;;  %1442 = vmatmul.msk.f32.gmra.mxu0 %vm79_vm0, %v30_v48 }
  0xa2   :  { %v301_v51 = vpop.f32.mrf.mxu0 }
  0xa3   :  { %v1494_v53 = vpop.eup %1493  ;;  %v302_v54 = vadd.f32 %v301_v51, %v2007_v35 }
  0xa4   :  { %588 = vmatmul.f32.gmra.mxu1 %v1494_v53  ;;  %v43_v53 = vld [vmem:[%s2825_s0 + $0x100] sm:$0xff] }
  0xa5   :  { %1495 = vtanh.f32 %v302_v54  ;;  %1443 = vmatmul.msk.f32.gmra.mxu0 %vm79_vm0, %v31_v52 }
  0xaa   :  { %v304_v55 = vpop.f32.mrf.mxu0 }
  0xab   :  { %v1496_v57 = vpop.eup %1495  ;;  %v305_v58 = vadd.f32 %v304_v55, %v2007_v35 }
  0xac   :  { %591 = vmatmul.f32.gmra.mxu1 %v1496_v57 }
  0xad   :  { %1497 = vtanh.f32 %v305_v58  ;;  %1444 = vmatmul.msk.f32.gmra.mxu0 %vm79_vm0, %v32_v56  ;;  %v561_v56 = vld [vmem:[%s2824_s1 + $0x108] sm:$0xff] }
  0xae   :  { %v2145_v57 = vperm.slane %v561_v56, 0 }
  0xb2   :  { %v307_v59 = vpop.f32.mrf.mxu0 }
  0xb3   :  { %v1498_v61 = vpop.eup %1497  ;;  %v308_v62 = vadd.f32 %v307_v59, %v2007_v35 }
  0xb4   :  { %594 = vmatmul.f32.gmra.mxu1 %v1498_v61  ;;  %v44_v61 = vld [vmem:[%s2825_s0 + $0x108] sm:$0xff] }
  0xb5   :  { %1499 = vtanh.f32 %v308_v62  ;;  %1445 = vmatmul.msk.f32.gmra.mxu0 %vm79_vm0, %v33_v60 }
  0xba   :  { %v310_v63 = vpop.f32.mrf.mxu0 }
  0xbb   :  { %v1500_v1 = vpop.eup %1499  ;;  %v311_v2 = vadd.f32 %v310_v63, %v2007_v35 }
  0xbc   :  { %597 = vmatmul.f32.gmra.mxu1 %v1500_v1 }
  0xbd   :  { %1501 = vtanh.f32 %v311_v2  ;;  %1446 = vmatmul.msk.f32.gmra.mxu0 %vm79_vm0, %v34_v0 }
  0xc2   :  { %v313_v3 = vpop.f32.mrf.mxu0 }
  0xc3   :  { %v1502_v5 = vpop.eup %1501  ;;  %v314_v6 = vadd.f32 %v313_v3, %v2007_v35 }
  0xc4   :  { %600 = vmatmul.f32.gmra.mxu1 %v1502_v5 }
  0xc5   :  { %1503 = vtanh.f32 %v314_v6  ;;  %1447 = vmatmul.msk.f32.gmra.mxu0 %vm79_vm0, %v35_v4  ;;  %v45_v4 = vld [vmem:[%s2825_s0 + $0x110] sm:$0xff] }
  0xca   :  { %v316_v7 = vpop.f32.mrf.mxu0 }
  0xcb   :  { %v1504_v9 = vpop.eup %1503  ;;  %v317_v10 = vadd.f32 %v316_v7, %v2007_v35 }
  0xcc   :  { %603 = vmatmul.f32.gmra.mxu1 %v1504_v9 }
  0xcd   :  { %1505 = vtanh.f32 %v317_v10  ;;  %1448 = vmatmul.msk.f32.gmra.mxu0 %vm79_vm0, %v36_v8 }
  0xd2   :  { %v319_v11 = vpop.f32.mrf.mxu0 }
  0xd3   :  { %v1506_v13 = vpop.eup %1505  ;;  %v320_v14 = vadd.f32 %v319_v11, %v2007_v35  ;;  %v46_v11 = vld [vmem:[%s2825_s0 + $0x118] sm:$0xff] }
  0xd4   :  { %606 = vmatmul.f32.gmra.mxu1 %v1506_v13 }
  0xd5   :  { %1507 = vtanh.f32 %v320_v14  ;;  %1449 = vmatmul.msk.f32.gmra.mxu0 %vm79_vm0, %v37_v12 }
  0xda   :  { %v322_v19 = vpop.f32.mrf.mxu0 }
  0xdb   :  { %v1508_v21 = vpop.eup %1507  ;;  %v323_v22 = vadd.f32 %v322_v19, %v2007_v35 }
  0xdc   :  { %609 = vmatmul.f32.gmra.mxu1 %v1508_v21 }
  0xdd   :  { %1509 = vtanh.f32 %v323_v22  ;;  %1450 = vmatmul.msk.f32.gmra.mxu0 %vm79_vm0, %v38_v20 }
  0xe2   :  { %v325_v27 = vpop.f32.mrf.mxu0 }
  0xe3   :  { %v1510_v29 = vpop.eup %1509  ;;  %v326_v30 = vadd.f32 %v325_v27, %v2007_v35 }
  0xe4   :  { %612 = vmatmul.f32.gmra.mxu1 %v1510_v29 }
  0xe5   :  { %1511 = vtanh.f32 %v326_v30  ;;  %1451 = vmatmul.msk.f32.gmra.mxu0 %vm79_vm0, %v39_v28 }
  0xea   :  { %v328_v36 = vpop.f32.mrf.mxu0 }
  0xeb   :  { %v1512_v38 = vpop.eup %1511  ;;  %v329_v39 = vadd.f32 %v328_v36, %v2007_v35 }
  0xec   :  { %615 = vmatmul.f32.gmra.mxu1 %v1512_v38 }
  0xed   :  { %1513 = vtanh.f32 %v329_v39  ;;  %1452 = vmatmul.msk.f32.gmra.mxu0 %vm79_vm0, %v40_v37 }
  0xf2   :  { %v331_v44 = vpop.f32.mrf.mxu0 }
  0xf3   :  { %v1514_v46 = vpop.eup %1513  ;;  %v332_v47 = vadd.f32 %v331_v44, %v2007_v35 }
  0xf4   :  { %618 = vmatmul.f32.gmra.mxu1 %v1514_v46 }
  0xf5   :  { %1515 = vtanh.f32 %v332_v47  ;;  %1453 = vmatmul.msk.f32.gmra.mxu0 %vm79_vm0, %v41_v45  ;;  %v51_v47 = vld [vmem:[%s2825_s0 + $0x140] sm:$0xff] }
  0xfa   :  { %v334_v48 = vpop.f32.mrf.mxu0 }
  0xfb   :  { %v1516_v50 = vpop.eup %1515  ;;  %v335_v51 = vadd.f32 %v334_v48, %v2007_v35 }
  0xfc   :  { %621 = vmatmul.f32.gmra.mxu1 %v1516_v50 }
  0xfd   :  { %1517 = vtanh.f32 %v335_v51  ;;  %1454 = vmatmul.msk.f32.gmra.mxu0 %vm79_vm0, %v42_v49 }
 0x102   :  { %v337_v52 = vpop.f32.mrf.mxu0 }
 0x103   :  { %v1518_v54 = vpop.eup %1517  ;;  %v338_v55 = vadd.f32 %v337_v52, %v2007_v35 }
 0x104   :  { %624 = vmatmul.f32.gmra.mxu1 %v1518_v54  ;;  %v52_v54 = vld [vmem:[%s2825_s0 + $0x148] sm:$0xff] }
 0x105   :  { %1519 = vtanh.f32 %v338_v55  ;;  %1455 = vmatmul.msk.f32.gmra.mxu0 %vm79_vm0, %v43_v53 }
 0x109   :  { %v580_v58 = vpop.f32.mrf.mxu1 }
 0x10a   :  { %v581_v59 = vadd.f32 %v580_v58, %v2145_v57  ;;  %v340_v60 = vpop.f32.mrf.mxu0 }
 0x10b   :  { %v1520_v62 = vpop.eup %1519  ;;  %v341_v63 = vadd.f32 %v340_v60, %v2007_v35 }
 0x10c   :  { %1521 = vtanh.f32 %v581_v59  ;;  %627 = vmatmul.f32.gmra.mxu1 %v1520_v62  ;;  %v53_v62 = vld [vmem:[%s2825_s0 + $0x150] sm:$0xff] }
 0x10d   :  { %1523 = vtanh.f32 %v341_v63  ;;  %1456 = vmatmul.msk.f32.gmra.mxu0 %vm79_vm0, %v44_v61 }
 0x111   :  { %v583_v0 = vpop.f32.mrf.mxu1 }
 0x112   :  { %v1522_v1 = vpop.eup %1521  ;;  %v584_v2 = vadd.f32 %v583_v0, %v2145_v57  ;;  %v343_v3 = vpop.f32.mrf.mxu0 }
 0x113   :  { %v1524_v5 = vpop.eup %1523  ;;  %v344_v6 = vadd.f32 %v343_v3, %v2007_v35  ;;  %870 = vmatmul.f32.vlgmr.msra.gmra.mxu2 %v1522_v1 }
 0x114   :  { %1525 = vtanh.f32 %v584_v2  ;;  %630 = vmatmul.f32.gmra.mxu1 %v1524_v5  ;;  %v54_v5 = vld [vmem:[%s2825_s0 + $0x158] sm:$0xff] }
 0x115   :  { %1527 = vtanh.f32 %v344_v6  ;;  %1457 = vmatmul.msk.f32.gmra.mxu0 %vm79_vm0, %v45_v4 }
 0x119   :  { %v586_v7 = vpop.f32.mrf.mxu1 }
 0x11a   :  { %v1526_v8 = vpop.eup %1525  ;;  %v587_v9 = vadd.f32 %v586_v7, %v2145_v57  ;;  %v346_v10 = vpop.f32.mrf.mxu0 }
 0x11b   :  { %v1528_v12 = vpop.eup %1527  ;;  %v347_v13 = vadd.f32 %v346_v10, %v2007_v35  ;;  %873 = vmatmul.f32.gmra.mxu2 %v1526_v8  ;;  %v1142_v8 = vld [vmem:[%s2824_s1 + $0x210] sm:$0xff] }
 0x11c   :  { %1529 = vtanh.f32 %v587_v9  ;;  %633 = vmatmul.f32.gmra.mxu1 %v1528_v12  ;;  %1145 = vmatpush.msra.mxu3 %v1142_v8 }
 0x11d   :  { %1531 = vtanh.f32 %v347_v13  ;;  %1458 = vmatmul.msk.f32.gmra.mxu0 %vm79_vm0, %v46_v11  ;;  %v55_v13 = vld [vmem:[%s2825_s0 + $0x160] sm:$0xff] }
 0x121   :  { %v589_v14 = vpop.f32.mrf.mxu1 }
 0x122   :  { %v1530_v15 = vpop.eup %1529  ;;  %v590_v16 = vadd.f32 %v589_v14, %v2145_v57  ;;  %v349_v17 = vpop.f32.mrf.mxu0  ;;  %v1141_v14 = vld [vmem:[%s2824_s1 + $0x208] sm:$0xff] }
 0x123   :  { %v1532_v19 = vpop.eup %1531  ;;  %v350_v20 = vadd.f32 %v349_v17, %v2007_v35  ;;  %876 = vmatmul.f32.gmra.mxu2 %v1530_v15  ;;  %1146 = vmatpush.msra.mxu3 %v1141_v14  ;;  %v1140_v17 = vld [vmem:[%s2824_s1 + $0x200] sm:$0xff] }
 0x124   :  { %1533 = vtanh.f32 %v590_v16  ;;  %636 = vmatmul.f32.gmra.mxu1 %v1532_v19  ;;  %v1138_v19 = vld [vmem:[%s2824_s1 + $0x1f0] sm:$0xff] }
 0x125   :  { %1535 = vtanh.f32 %v350_v20  ;;  %1459 = vmatmul.msk.f32.gmra.mxu0 %vm79_vm0, %v47_v18  ;;  %1147 = vmatpush.msra.mxu3 %v1140_v17  ;;  %v1139_v18 = vld [vmem:[%s2824_s1 + $0x1f8] sm:$0xff] }
 0x127   :  { %1148 = vmatpush.msra.mxu3 %v1139_v18 }
 0x129   :  { %v592_v21 = vpop.f32.mrf.mxu1  ;;  %1149 = vmatpush.msra.mxu3 %v1138_v19  ;;  %v62_v19 = vld [vmem:[%s2825_s0 + $0x198] sm:$0xff] }
 0x12a   :  { %v1534_v22 = vpop.eup %1533  ;;  %v593_v23 = vadd.f32 %v592_v21, %v2145_v57  ;;  %v352_v24 = vpop.f32.mrf.mxu0 }
 0x12b   :  { %v1536_v26 = vpop.eup %1535  ;;  %v353_v27 = vadd.f32 %v352_v24, %v2007_v35  ;;  %879 = vmatmul.f32.gmra.mxu2 %v1534_v22  ;;  %v56_v24 = vld [vmem:[%s2825_s0 + $0x168] sm:$0xff] }
 0x12c   :  { %1537 = vtanh.f32 %v593_v23  ;;  %639 = vmatmul.f32.gmra.mxu1 %v1536_v26 }
 0x12d   :  { %1539 = vtanh.f32 %v353_v27  ;;  %1460 = vmatmul.msk.f32.gmra.mxu0 %vm79_vm0, %v48_v25  ;;  %v1137_v25 = vld [vmem:[%s2824_s1 + $0x1e8] sm:$0xff] }
 0x12e   :  { %1150 = vmatpush.msra.mxu3 %v1137_v25 }
 0x131   :  { %v595_v28 = vpop.f32.mrf.mxu1 }
 0x132   :  { %v1538_v29 = vpop.eup %1537  ;;  %v596_v30 = vadd.f32 %v595_v28, %v2145_v57  ;;  %v355_v31 = vpop.f32.mrf.mxu0  ;;  %v1136_v28 = vld [vmem:[%s2824_s1 + $0x1e0] sm:$0xff] }
 0x133   :  { %v1540_v33 = vpop.eup %1539  ;;  %v356_v34 = vadd.f32 %v355_v31, %v2007_v35  ;;  %882 = vmatmul.f32.gmra.mxu2 %v1538_v29  ;;  %1151 = vmatpush.msra.mxu3 %v1136_v28  ;;  %v1135_v29 = vld [vmem:[%s2824_s1 + $0x1d8] sm:$0xff] }
 0x134   :  { %1541 = vtanh.f32 %v596_v30  ;;  %642 = vmatmul.f32.gmra.mxu1 %v1540_v33  ;;  %v1134_v30 = vld [vmem:[%s2824_s1 + $0x1d0] sm:$0xff] }
 0x135   :  { %1543 = vtanh.f32 %v356_v34  ;;  %1461 = vmatmul.msk.f32.gmra.mxu0 %vm79_vm0, %v49_v32  ;;  %1152 = vmatpush.msra.mxu3 %v1135_v29  ;;  %v63_v29 = vld [vmem:[%s2825_s0 + $0x1a0] sm:$0xff] }
 0x137   :  { %1153 = vmatpush.msra.mxu3 %v1134_v30 }
 0x139   :  { %v598_v36 = vpop.f32.mrf.mxu1 }
 0x13a   :  { %v1542_v37 = vpop.eup %1541  ;;  %v599_v38 = vadd.f32 %v598_v36, %v2145_v57  ;;  %v358_v39 = vpop.f32.mrf.mxu0  ;;  %v57_v36 = vld [vmem:[%s2825_s0 + $0x170] sm:$0xff] }
 0x13b   :  { %v1544_v41 = vpop.eup %1543  ;;  %v359_v42 = vadd.f32 %v358_v39, %v2007_v35  ;;  %885 = vmatmul.f32.gmra.mxu2 %v1542_v37  ;;  %v1133_v37 = vld [vmem:[%s2824_s1 + $0x1c8] sm:$0xff] }
 0x13c   :  { %1545 = vtanh.f32 %v599_v38  ;;  %645 = vmatmul.f32.gmra.mxu1 %v1544_v41  ;;  %1154 = vmatpush.msra.mxu3 %v1133_v37  ;;  %v1131_v41 = vld [vmem:[%s2824_s1 + $0x1b8] sm:$0xff] }
 0x13d   :  { %1547 = vtanh.f32 %v359_v42  ;;  %1462 = vmatmul.msk.f32.gmra.mxu0 %vm79_vm0, %v50_v40  ;;  %v1132_v40 = vld [vmem:[%s2824_s1 + $0x1c0] sm:$0xff]  ;;  %v1130_v42 = vld [vmem:[%s2824_s1 + $0x1b0] sm:$0xff] }
 0x13e   :  { %1155 = vmatpush.msra.mxu3 %v1132_v40  ;;  %v64_v40 = vld [vmem:[%s2825_s0 + $0x1a8] sm:$0xff] }
 0x140   :  { %1156 = vmatpush.msra.mxu3 %v1131_v41 }
 0x141   :  { %v601_v43 = vpop.f32.mrf.mxu1 }
 0x142   :  { %v1546_v44 = vpop.eup %1545  ;;  %v602_v45 = vadd.f32 %v601_v43, %v2145_v57  ;;  %v361_v46 = vpop.f32.mrf.mxu0  ;;  %1157 = vmatpush.msra.mxu3 %v1130_v42 }
 0x143   :  { %v1548_v48 = vpop.eup %1547  ;;  %v362_v49 = vadd.f32 %v361_v46, %v2007_v35  ;;  %888 = vmatmul.f32.gmra.mxu2 %v1546_v44 }
 0x144   :  { %1549 = vtanh.f32 %v602_v45  ;;  %648 = vmatmul.f32.gmra.mxu1 %v1548_v48  ;;  %v1129_v48 = vld [vmem:[%s2824_s1 + $0x1a8] sm:$0xff] }
 0x145   :  { %1551 = vtanh.f32 %v362_v49  ;;  %1463 = vmatmul.msk.f32.gmra.mxu0 %vm79_vm0, %v51_v47  ;;  %v58_v47 = vld [vmem:[%s2825_s0 + $0x178] sm:$0xff]  ;;  %1158 = vmatpush.msra.mxu3 %v1129_v48 }
 0x149   :  { %v604_v50 = vpop.f32.mrf.mxu1 }
 0x14a   :  { %v1550_v51 = vpop.eup %1549  ;;  %v605_v52 = vadd.f32 %v604_v50, %v2145_v57  ;;  %v364_v53 = vpop.f32.mrf.mxu0 }
 0x14b   :  { %v1552_v55 = vpop.eup %1551  ;;  %v365_v56 = vadd.f32 %v364_v53, %v2007_v35  ;;  %891 = vmatmul.f32.gmra.mxu2 %v1550_v51  ;;  %v1128_v51 = vld [vmem:[%s2824_s1 + $0x1a0] sm:$0xff] }
 0x14c   :  { %1553 = vtanh.f32 %v605_v52  ;;  %651 = vmatmul.f32.gmra.mxu1 %v1552_v55  ;;  %1159 = vmatpush.msra.mxu3 %v1128_v51  ;;  %v1127_v52 = vld [vmem:[%s2824_s1 + $0x198] sm:$0xff] }
 0x14d   :  { %1555 = vtanh.f32 %v365_v56  ;;  %1464 = vmatmul.msk.f32.gmra.mxu0 %vm79_vm0, %v52_v54 }
 0x14e   :  { %1160 = vmatpush.msra.mxu3 %v1127_v52 }
 0x151   :  { %v607_v58 = vpop.f32.mrf.mxu1 }
 0x152   :  { %v1554_v59 = vpop.eup %1553  ;;  %v608_v60 = vadd.f32 %v607_v58, %v2145_v57  ;;  %v367_v61 = vpop.f32.mrf.mxu0  ;;  %v59_v58 = vld [vmem:[%s2825_s0 + $0x180] sm:$0xff] }
 0x153   :  { %v1556_v63 = vpop.eup %1555  ;;  %v368_v0 = vadd.f32 %v367_v61, %v2007_v35  ;;  %894 = vmatmul.f32.gmra.mxu2 %v1554_v59 }
 0x154   :  { %1557 = vtanh.f32 %v608_v60  ;;  %654 = vmatmul.f32.gmra.mxu1 %v1556_v63 }
 0x155   :  { %1559 = vtanh.f32 %v368_v0  ;;  %1465 = vmatmul.msk.f32.gmra.mxu0 %vm79_vm0, %v53_v62 }
 0x159   :  { %v610_v1 = vpop.f32.mrf.mxu1 }
 0x15a   :  { %v1558_v2 = vpop.eup %1557  ;;  %v611_v3 = vadd.f32 %v610_v1, %v2145_v57  ;;  %v370_v4 = vpop.f32.mrf.mxu0  ;;  %v60_v1 = vld [vmem:[%s2825_s0 + $0x188] sm:$0xff] }
 0x15b   :  { %v1560_v6 = vpop.eup %1559  ;;  %v371_v7 = vadd.f32 %v370_v4, %v2007_v35  ;;  %897 = vmatmul.f32.gmra.mxu2 %v1558_v2  ;;  %v852_v4 = vld [vmem:[%s2824_s1 + $0x190] sm:$0xff] }
 0x15c   :  { %1561 = vtanh.f32 %v611_v3  ;;  %657 = vmatmul.f32.gmra.mxu1 %v1560_v6 }
 0x15d   :  { %1563 = vtanh.f32 %v371_v7  ;;  %1466 = vmatmul.msk.f32.gmra.mxu0 %vm79_vm0, %v54_v5 }
 0x161   :  { %v613_v9 = vpop.f32.mrf.mxu1 }
 0x162   :  { %v1562_v10 = vpop.eup %1561  ;;  %v614_v11 = vadd.f32 %v613_v9, %v2145_v57  ;;  %v373_v12 = vpop.f32.mrf.mxu0  ;;  %v61_v9 = vld [vmem:[%s2825_s0 + $0x190] sm:$0xff] }
 0x163   :  { %v1564_v15 = vpop.eup %1563  ;;  %v374_v16 = vadd.f32 %v373_v12, %v2007_v35  ;;  %900 = vmatmul.f32.gmra.mxu2 %v1562_v10  ;;  %v2305_v12 = vperm.slane %v852_v4, 0 }
 0x164   :  { %1565 = vtanh.f32 %v614_v11  ;;  %660 = vmatmul.f32.gmra.mxu1 %v1564_v15 }
 0x165   :  { %1567 = vtanh.f32 %v374_v16  ;;  %1467 = vmatmul.msk.f32.gmra.mxu0 %vm79_vm0, %v55_v13 }
 0x169   :  { %v616_v20 = vpop.f32.mrf.mxu1 }
 0x16a   :  { %v1566_v21 = vpop.eup %1565  ;;  %v617_v22 = vadd.f32 %v616_v20, %v2145_v57  ;;  %v376_v23 = vpop.f32.mrf.mxu0 }
 0x16b   :  { %v1568_v26 = vpop.eup %1567  ;;  %v377_v27 = vadd.f32 %v376_v23, %v2007_v35  ;;  %903 = vmatmul.f32.gmra.mxu2 %v1566_v21 }
 0x16c   :  { %1569 = vtanh.f32 %v617_v22  ;;  %663 = vmatmul.f32.gmra.mxu1 %v1568_v26 }
 0x16d   :  { %1571 = vtanh.f32 %v377_v27  ;;  %1468 = vmatmul.msk.f32.gmra.mxu0 %vm79_vm0, %v56_v24 }
 0x171   :  { %v619_v31 = vpop.f32.mrf.mxu1 }
 0x172   :  { %v1570_v32 = vpop.eup %1569  ;;  %v620_v33 = vadd.f32 %v619_v31, %v2145_v57  ;;  %v379_v34 = vpop.f32.mrf.mxu0 }
 0x173   :  { %v1572_v38 = vpop.eup %1571  ;;  %v380_v39 = vadd.f32 %v379_v34, %v2007_v35  ;;  %906 = vmatmul.f32.gmra.mxu2 %v1570_v32 }
 0x174   :  { %1573 = vtanh.f32 %v620_v33  ;;  %666 = vmatmul.f32.gmra.mxu1 %v1572_v38 }
 0x175   :  { %1575 = vtanh.f32 %v380_v39  ;;  %1469 = vmatmul.msk.f32.gmra.mxu0 %vm79_vm0, %v57_v36 }
 0x179   :  { %v622_v43 = vpop.f32.mrf.mxu1 }
 0x17a   :  { %v1574_v44 = vpop.eup %1573  ;;  %v623_v45 = vadd.f32 %v622_v43, %v2145_v57  ;;  %v382_v46 = vpop.f32.mrf.mxu0 }
 0x17b   :  { %v1576_v49 = vpop.eup %1575  ;;  %v383_v50 = vadd.f32 %v382_v46, %v2007_v35  ;;  %909 = vmatmul.f32.gmra.mxu2 %v1574_v44 }
 0x17c   :  { %1577 = vtanh.f32 %v623_v45  ;;  %669 = vmatmul.f32.gmra.mxu1 %v1576_v49 }
 0x17d   :  { %1579 = vtanh.f32 %v383_v50  ;;  %1470 = vmatmul.msk.f32.gmra.mxu0 %vm79_vm0, %v58_v47  ;;  %v65_v50 = vld [vmem:[%s2825_s0 + $0x1b0] sm:$0xff] }
 0x181   :  { %v625_v53 = vpop.f32.mrf.mxu1 }
 0x182   :  { %v1578_v54 = vpop.eup %1577  ;;  %v626_v55 = vadd.f32 %v625_v53, %v2145_v57  ;;  %v385_v56 = vpop.f32.mrf.mxu0 }
 0x183   :  { %v1580_v59 = vpop.eup %1579  ;;  %v386_v60 = vadd.f32 %v385_v56, %v2007_v35  ;;  %912 = vmatmul.f32.gmra.mxu2 %v1578_v54 }
 0x184   :  { %1581 = vtanh.f32 %v626_v55  ;;  %672 = vmatmul.f32.gmra.mxu1 %v1580_v59 }
 0x185   :  { %1583 = vtanh.f32 %v386_v60  ;;  %1471 = vmatmul.msk.f32.gmra.mxu0 %vm79_vm0, %v59_v58 }
 0x189   :  { %v628_v61 = vpop.f32.mrf.mxu1 }
 0x18a   :  { %v1582_v62 = vpop.eup %1581  ;;  %v629_v63 = vadd.f32 %v628_v61, %v2145_v57  ;;  %v388_v0 = vpop.f32.mrf.mxu0  ;;  %v66_v61 = vld [vmem:[%s2825_s0 + $0x1b8] sm:$0xff] }
 0x18b   :  { %v1584_v2 = vpop.eup %1583  ;;  %v389_v3 = vadd.f32 %v388_v0, %v2007_v35  ;;  %915 = vmatmul.f32.gmra.mxu2 %v1582_v62 }
 0x18c   :  { %1585 = vtanh.f32 %v629_v63  ;;  %675 = vmatmul.f32.gmra.mxu1 %v1584_v2 }
 0x18d   :  { %1587 = vtanh.f32 %v389_v3  ;;  %1472 = vmatmul.msk.f32.gmra.mxu0 %vm79_vm0, %v60_v1 }
 0x191   :  { %v631_v5 = vpop.f32.mrf.mxu1 }
 0x192   :  { %v1586_v6 = vpop.eup %1585  ;;  %v632_v7 = vadd.f32 %v631_v5, %v2145_v57  ;;  %v391_v8 = vpop.f32.mrf.mxu0 }
 0x193   :  { %v1588_v10 = vpop.eup %1587  ;;  %v392_v11 = vadd.f32 %v391_v8, %v2007_v35  ;;  %918 = vmatmul.f32.gmra.mxu2 %v1586_v6 }
 0x194   :  { %1589 = vtanh.f32 %v632_v7  ;;  %678 = vmatmul.f32.gmra.mxu1 %v1588_v10  ;;  %v67_v7 = vld [vmem:[%s2825_s0 + $0x1c0] sm:$0xff] }
 0x195   :  { %1591 = vtanh.f32 %v392_v11  ;;  %1473 = vmatmul.msk.f32.gmra.mxu0 %vm79_vm0, %v61_v9 }
 0x196   :  { %v871_v13 = vpop.f32.mrf.mxu2 }
 0x197   :  { %v872_v14 = vadd.f32 %v871_v13, %v2305_v12 }
 0x199   :  { %1593 = vtanh.f32 %v872_v14  ;;  %v634_v15 = vpop.f32.mrf.mxu1 }
 0x19a   :  { %v1590_v16 = vpop.eup %1589  ;;  %v635_v17 = vadd.f32 %v634_v15, %v2145_v57  ;;  %v394_v18 = vpop.f32.mrf.mxu0 }
 0x19b   :  { %v1592_v20 = vpop.eup %1591  ;;  %v395_v21 = vadd.f32 %v394_v18, %v2007_v35  ;;  %921 = vmatmul.f32.gmra.mxu2 %v1590_v16  ;;  %v68_v18 = vld [vmem:[%s2825_s0 + $0x1c8] sm:$0xff] }
 0x19c   :  { %1595 = vtanh.f32 %v635_v17  ;;  %681 = vmatmul.f32.gmra.mxu1 %v1592_v20 }
 0x19d   :  { %1597 = vtanh.f32 %v395_v21  ;;  %1474 = vmatmul.msk.f32.gmra.mxu0 %vm79_vm0, %v62_v19 }
 0x19e   :  { %v874_v22 = vpop.f32.mrf.mxu2 }
 0x19f   :  { %v1594_v23 = vpop.eup %1593  ;;  %v875_v24 = vadd.f32 %v874_v22, %v2305_v12 }
 0x1a0   :  { %1161 = vmatmul.f32.vlgmr.msra.gmra.mxu3 %v1594_v23 }
 0x1a1   :  { %1599 = vtanh.f32 %v875_v24  ;;  %v637_v25 = vpop.f32.mrf.mxu1 }
 0x1a2   :  { %v1596_v26 = vpop.eup %1595  ;;  %v638_v27 = vadd.f32 %v637_v25, %v2145_v57  ;;  %v397_v28 = vpop.f32.mrf.mxu0 }
 0x1a3   :  { %v1598_v30 = vpop.eup %1597  ;;  %v398_v31 = vadd.f32 %v397_v28, %v2007_v35  ;;  %924 = vmatmul.f32.gmra.mxu2 %v1596_v26  ;;  %v69_v28 = vld [vmem:[%s2825_s0 + $0x1d0] sm:$0xff] }
 0x1a4   :  { %1601 = vtanh.f32 %v638_v27  ;;  %684 = vmatmul.f32.gmra.mxu1 %v1598_v30 }
 0x1a5   :  { %1603 = vtanh.f32 %v398_v31  ;;  %1475 = vmatmul.msk.f32.gmra.mxu0 %vm79_vm0, %v63_v29 }
 0x1a6   :  { %v877_v32 = vpop.f32.mrf.mxu2 }
 0x1a7   :  { %v1600_v33 = vpop.eup %1599  ;;  %v878_v34 = vadd.f32 %v877_v32, %v2305_v12 }
 0x1a8   :  { %1164 = vmatmul.f32.gmra.mxu3 %v1600_v33 }
 0x1a9   :  { %1605 = vtanh.f32 %v878_v34  ;;  %v640_v36 = vpop.f32.mrf.mxu1 }
 0x1aa   :  { %v1602_v37 = vpop.eup %1601  ;;  %v641_v38 = vadd.f32 %v640_v36, %v2145_v57  ;;  %v400_v39 = vpop.f32.mrf.mxu0 }
 0x1ab   :  { %v1604_v41 = vpop.eup %1603  ;;  %v401_v42 = vadd.f32 %v400_v39, %v2007_v35  ;;  %927 = vmatmul.f32.gmra.mxu2 %v1602_v37  ;;  %v70_v39 = vld [vmem:[%s2825_s0 + $0x1d8] sm:$0xff] }
 0x1ac   :  { %1607 = vtanh.f32 %v641_v38  ;;  %687 = vmatmul.f32.gmra.mxu1 %v1604_v41 }
 0x1ad   :  { %1609 = vtanh.f32 %v401_v42  ;;  %1476 = vmatmul.msk.f32.gmra.mxu0 %vm79_vm0, %v64_v40 }
 0x1ae   :  { %v880_v43 = vpop.f32.mrf.mxu2 }
 0x1af   :  { %v1606_v44 = vpop.eup %1605  ;;  %v881_v45 = vadd.f32 %v880_v43, %v2305_v12 }
 0x1b0   :  { %1167 = vmatmul.f32.gmra.mxu3 %v1606_v44 }
 0x1b1   :  { %1611 = vtanh.f32 %v881_v45  ;;  %v643_v46 = vpop.f32.mrf.mxu1 }
 0x1b2   :  { %v1608_v47 = vpop.eup %1607  ;;  %v644_v48 = vadd.f32 %v643_v46, %v2145_v57  ;;  %v403_v49 = vpop.f32.mrf.mxu0 }
 0x1b3   :  { %v1610_v51 = vpop.eup %1609  ;;  %v404_v52 = vadd.f32 %v403_v49, %v2007_v35  ;;  %930 = vmatmul.f32.gmra.mxu2 %v1608_v47  ;;  %v71_v49 = vld [vmem:[%s2825_s0 + $0x1e0] sm:$0xff] }
 0x1b4   :  { %1613 = vtanh.f32 %v644_v48  ;;  %690 = vmatmul.f32.gmra.mxu1 %v1610_v51 }
 0x1b5   :  { %1615 = vtanh.f32 %v404_v52  ;;  %1477 = vmatmul.msk.f32.gmra.mxu0 %vm79_vm0, %v65_v50 }
 0x1b6   :  { %v883_v53 = vpop.f32.mrf.mxu2 }
 0x1b7   :  { %v1612_v54 = vpop.eup %1611  ;;  %v884_v55 = vadd.f32 %v883_v53, %v2305_v12 }
 0x1b8   :  { %1170 = vmatmul.f32.gmra.mxu3 %v1612_v54 }
 0x1b9   :  { %1617 = vtanh.f32 %v884_v55  ;;  %v646_v56 = vpop.f32.mrf.mxu1 }
 0x1ba   :  { %v1614_v58 = vpop.eup %1613  ;;  %v647_v59 = vadd.f32 %v646_v56, %v2145_v57  ;;  %v406_v60 = vpop.f32.mrf.mxu0 }
 0x1bb   :  { %v1616_v62 = vpop.eup %1615  ;;  %v407_v63 = vadd.f32 %v406_v60, %v2007_v35  ;;  %933 = vmatmul.f32.gmra.mxu2 %v1614_v58  ;;  %v72_v60 = vld [vmem:[%s2825_s0 + $0x1e8] sm:$0xff] }
 0x1bc   :  { %1619 = vtanh.f32 %v647_v59  ;;  %693 = vmatmul.f32.gmra.mxu1 %v1616_v62 }
 0x1bd   :  { %1621 = vtanh.f32 %v407_v63  ;;  %1478 = vmatmul.msk.f32.gmra.mxu0 %vm79_vm0, %v66_v61 }
 0x1be   :  { %v886_v0 = vpop.f32.mrf.mxu2 }
 0x1bf   :  { %v1618_v1 = vpop.eup %1617  ;;  %v887_v2 = vadd.f32 %v886_v0, %v2305_v12 }
 0x1c0   :  { %1173 = vmatmul.f32.gmra.mxu3 %v1618_v1 }
 0x1c1   :  { %1623 = vtanh.f32 %v887_v2  ;;  %v649_v3 = vpop.f32.mrf.mxu1 }
 0x1c2   :  { %v1620_v4 = vpop.eup %1619  ;;  %v650_v5 = vadd.f32 %v649_v3, %v2145_v57  ;;  %v409_v6 = vpop.f32.mrf.mxu0 }
 0x1c3   :  { %v1622_v8 = vpop.eup %1621  ;;  %v410_v9 = vadd.f32 %v409_v6, %v2007_v35  ;;  %936 = vmatmul.f32.gmra.mxu2 %v1620_v4  ;;  %v73_v6 = vld [vmem:[%s2825_s0 + $0x1f0] sm:$0xff] }
 0x1c4   :  { %1625 = vtanh.f32 %v650_v5  ;;  %696 = vmatmul.f32.gmra.mxu1 %v1622_v8 }
 0x1c5   :  { %1627 = vtanh.f32 %v410_v9  ;;  %1479 = vmatmul.msk.f32.gmra.mxu0 %vm79_vm0, %v67_v7 }
 0x1c6   :  { %v889_v10 = vpop.f32.mrf.mxu2 }
 0x1c7   :  { %v1624_v11 = vpop.eup %1623  ;;  %v890_v13 = vadd.f32 %v889_v10, %v2305_v12 }
 0x1c8   :  { %1176 = vmatmul.f32.gmra.mxu3 %v1624_v11 }
 0x1c9   :  { %1629 = vtanh.f32 %v890_v13  ;;  %v652_v14 = vpop.f32.mrf.mxu1 }
 0x1ca   :  { %v1626_v15 = vpop.eup %1625  ;;  %v653_v16 = vadd.f32 %v652_v14, %v2145_v57  ;;  %v412_v17 = vpop.f32.mrf.mxu0 }
 0x1cb   :  { %v1628_v19 = vpop.eup %1627  ;;  %v413_v20 = vadd.f32 %v412_v17, %v2007_v35  ;;  %939 = vmatmul.f32.gmra.mxu2 %v1626_v15  ;;  %v74_v17 = vld [vmem:[%s2825_s0 + $0x1f8] sm:$0xff] }
 0x1cc   :  { %1631 = vtanh.f32 %v653_v16  ;;  %699 = vmatmul.f32.gmra.mxu1 %v1628_v19 }
 0x1cd   :  { %1633 = vtanh.f32 %v413_v20  ;;  %1480 = vmatmul.msk.f32.gmra.mxu0 %vm79_vm0, %v68_v18 }
 0x1ce   :  { %v892_v21 = vpop.f32.mrf.mxu2 }
 0x1cf   :  { %v1630_v22 = vpop.eup %1629  ;;  %v893_v23 = vadd.f32 %v892_v21, %v2305_v12 }
 0x1d0   :  { %1179 = vmatmul.f32.gmra.mxu3 %v1630_v22 }
 0x1d1   :  { %1635 = vtanh.f32 %v893_v23  ;;  %v655_v24 = vpop.f32.mrf.mxu1 }
 0x1d2   :  { %v1632_v25 = vpop.eup %1631  ;;  %v656_v26 = vadd.f32 %v655_v24, %v2145_v57  ;;  %v415_v27 = vpop.f32.mrf.mxu0 }
 0x1d3   :  { %v1634_v29 = vpop.eup %1633  ;;  %v416_v30 = vadd.f32 %v415_v27, %v2007_v35  ;;  %942 = vmatmul.f32.gmra.mxu2 %v1632_v25 }
 0x1d4   :  { %1637 = vtanh.f32 %v656_v26  ;;  %702 = vmatmul.f32.gmra.mxu1 %v1634_v29 }
 0x1d5   :  { %1639 = vtanh.f32 %v416_v30  ;;  %1481 = vmatmul.msk.f32.gmra.mxu0 %vm79_vm0, %v69_v28 }
 0x1d6   :  { %v895_v31 = vpop.f32.mrf.mxu2 }
 0x1d7   :  { %v1636_v32 = vpop.eup %1635  ;;  %v896_v33 = vadd.f32 %v895_v31, %v2305_v12 }
 0x1d8   :  { %1182 = vmatmul.f32.gmra.mxu3 %v1636_v32 }
 0x1d9   :  { %1641 = vtanh.f32 %v896_v33  ;;  %v658_v34 = vpop.f32.mrf.mxu1 }
 0x1da   :  { %v1638_v36 = vpop.eup %1637  ;;  %v659_v37 = vadd.f32 %v658_v34, %v2145_v57  ;;  %v418_v38 = vpop.f32.mrf.mxu0 }
 0x1db   :  { %v1640_v40 = vpop.eup %1639  ;;  %v419_v41 = vadd.f32 %v418_v38, %v2007_v35  ;;  %945 = vmatmul.f32.gmra.mxu2 %v1638_v36 }
 0x1dc   :  { %1643 = vtanh.f32 %v659_v37  ;;  %705 = vmatmul.f32.gmra.mxu1 %v1640_v40 }
 0x1dd   :  { %1645 = vtanh.f32 %v419_v41  ;;  %1482 = vmatmul.msk.f32.gmra.mxu0 %vm79_vm0, %v70_v39 }
 0x1de   :  { %v898_v42 = vpop.f32.mrf.mxu2 }
 0x1df   :  { %v1642_v43 = vpop.eup %1641  ;;  %v899_v44 = vadd.f32 %v898_v42, %v2305_v12 }
 0x1e0   :  { %1185 = vmatmul.f32.gmra.mxu3 %v1642_v43 }
 0x1e1   :  { %1647 = vtanh.f32 %v899_v44  ;;  %v661_v45 = vpop.f32.mrf.mxu1 }
 0x1e2   :  { %v1644_v46 = vpop.eup %1643  ;;  %v662_v47 = vadd.f32 %v661_v45, %v2145_v57  ;;  %v421_v48 = vpop.f32.mrf.mxu0 }
 0x1e3   :  { %v1646_v50 = vpop.eup %1645  ;;  %v422_v51 = vadd.f32 %v421_v48, %v2007_v35  ;;  %948 = vmatmul.f32.gmra.mxu2 %v1644_v46 }
 0x1e4   :  { %1649 = vtanh.f32 %v662_v47  ;;  %708 = vmatmul.f32.gmra.mxu1 %v1646_v50 }
 0x1e5   :  { %1651 = vtanh.f32 %v422_v51  ;;  %1483 = vmatmul.msk.f32.gmra.mxu0 %vm79_vm0, %v71_v49 }
 0x1e6   :  { %v901_v52 = vpop.f32.mrf.mxu2 }
 0x1e7   :  { %v1648_v53 = vpop.eup %1647  ;;  %v902_v54 = vadd.f32 %v901_v52, %v2305_v12 }
 0x1e8   :  { %1188 = vmatmul.f32.gmra.mxu3 %v1648_v53 }
 0x1e9   :  { %1653 = vtanh.f32 %v902_v54  ;;  %v664_v55 = vpop.f32.mrf.mxu1 }
 0x1ea   :  { %v1650_v56 = vpop.eup %1649  ;;  %v665_v58 = vadd.f32 %v664_v55, %v2145_v57  ;;  %v424_v59 = vpop.f32.mrf.mxu0 }
 0x1eb   :  { %v1652_v61 = vpop.eup %1651  ;;  %v425_v62 = vadd.f32 %v424_v59, %v2007_v35  ;;  %951 = vmatmul.f32.gmra.mxu2 %v1650_v56 }
 0x1ec   :  { %1655 = vtanh.f32 %v665_v58  ;;  %711 = vmatmul.f32.gmra.mxu1 %v1652_v61  ;;  %v1143_v58 = vld [vmem:[%s2824_s1 + $0x218] sm:$0xff] }
 0x1ed   :  { %1657 = vtanh.f32 %v425_v62  ;;  %1484 = vmatmul.msk.f32.gmra.mxu0 %vm79_vm0, %v72_v60  ;;  %v2415_v62 = vperm.slane %v1143_v58, 0 }
 0x1ee   :  { %v904_v63 = vpop.f32.mrf.mxu2 }
 0x1ef   :  { %v1654_v0 = vpop.eup %1653  ;;  %v905_v1 = vadd.f32 %v904_v63, %v2305_v12 }
 0x1f0   :  { %1191 = vmatmul.f32.gmra.mxu3 %v1654_v0 }
 0x1f1   :  { %1659 = vtanh.f32 %v905_v1  ;;  %v667_v2 = vpop.f32.mrf.mxu1 }
 0x1f2   :  { %v1656_v3 = vpop.eup %1655  ;;  %v668_v4 = vadd.f32 %v667_v2, %v2145_v57  ;;  %v427_v5 = vpop.f32.mrf.mxu0 }
 0x1f3   :  { %v1658_v7 = vpop.eup %1657  ;;  %v428_v8 = vadd.f32 %v427_v5, %v2007_v35  ;;  %954 = vmatmul.f32.gmra.mxu2 %v1656_v3 }
 0x1f4   :  { %1661 = vtanh.f32 %v668_v4  ;;  %714 = vmatmul.f32.gmra.mxu1 %v1658_v7 }
 0x1f5   :  { %1663 = vtanh.f32 %v428_v8  ;;  %1485 = vmatmul.msk.f32.gmra.mxu0 %vm79_vm0, %v73_v6 }
 0x1f6   :  { %v907_v9 = vpop.f32.mrf.mxu2 }
 0x1f7   :  { %v1660_v10 = vpop.eup %1659  ;;  %v908_v11 = vadd.f32 %v907_v9, %v2305_v12 }
 0x1f8   :  { %1194 = vmatmul.f32.gmra.mxu3 %v1660_v10 }
 0x1f9   :  { %1665 = vtanh.f32 %v908_v11  ;;  %v670_v13 = vpop.f32.mrf.mxu1 }
 0x1fa   :  { %v1662_v14 = vpop.eup %1661  ;;  %v671_v15 = vadd.f32 %v670_v13, %v2145_v57  ;;  %v430_v16 = vpop.f32.mrf.mxu0 }
 0x1fb   :  { %v1664_v18 = vpop.eup %1663  ;;  %v431_v19 = vadd.f32 %v430_v16, %v2007_v35  ;;  %957 = vmatmul.f32.gmra.mxu2 %v1662_v14 }
 0x1fc   :  { %1667 = vtanh.f32 %v671_v15  ;;  %717 = vmatmul.f32.gmra.mxu1 %v1664_v18 }
 0x1fd   :  { %1669 = vtanh.f32 %v431_v19  ;;  %1486 = vmatmul.msk.f32.gmra.mxu0 %vm79_vm0, %v74_v17 }
 0x1fe   :  { %v910_v20 = vpop.f32.mrf.mxu2 }
 0x1ff   :  { %v1666_v21 = vpop.eup %1665  ;;  %v911_v22 = vadd.f32 %v910_v20, %v2305_v12 }
 0x200   :  { %1197 = vmatmul.f32.gmra.mxu3 %v1666_v21 }
 0x201   :  { %1671 = vtanh.f32 %v911_v22  ;;  %v673_v23 = vpop.f32.mrf.mxu1 }
 0x202   :  { %v1668_v24 = vpop.eup %1667  ;;  %v674_v25 = vadd.f32 %v673_v23, %v2145_v57  ;;  %v433_v26 = vpop.f32.mrf.mxu0 }
 0x203   :  { %v1670_v27 = vpop.eup %1669  ;;  %v434_v28 = vadd.f32 %v433_v26, %v2007_v35  ;;  %960 = vmatmul.f32.gmra.mxu2 %v1668_v24 }
 0x204   :  { %1673 = vtanh.f32 %v674_v25  ;;  %720 = vmatmul.f32.gmra.mxu1 %v1670_v27 }
 0x205   :  { %1675 = vtanh.f32 %v434_v28 }
 0x206   :  { %v913_v29 = vpop.f32.mrf.mxu2 }
 0x207   :  { %v1672_v30 = vpop.eup %1671  ;;  %v914_v31 = vadd.f32 %v913_v29, %v2305_v12 }
 0x208   :  { %1200 = vmatmul.f32.gmra.mxu3 %v1672_v30 }
 0x209   :  { %1677 = vtanh.f32 %v914_v31  ;;  %v676_v32 = vpop.f32.mrf.mxu1 }
 0x20a   :  { %v1674_v33 = vpop.eup %1673  ;;  %v677_v34 = vadd.f32 %v676_v32, %v2145_v57  ;;  %v436_v36 = vpop.f32.mrf.mxu0 }
 0x20b   :  { %v1676_v37 = vpop.eup %1675  ;;  %v437_v38 = vadd.f32 %v436_v36, %v2007_v35  ;;  %963 = vmatmul.f32.gmra.mxu2 %v1674_v33 }
 0x20c   :  { %1679 = vtanh.f32 %v677_v34  ;;  %723 = vmatmul.f32.gmra.mxu1 %v1676_v37 }
 0x20d   :  { %1681 = vtanh.f32 %v437_v38 }
 0x20e   :  { %v916_v39 = vpop.f32.mrf.mxu2 }
 0x20f   :  { %v1678_v40 = vpop.eup %1677  ;;  %v917_v41 = vadd.f32 %v916_v39, %v2305_v12 }
 0x210   :  { %1203 = vmatmul.f32.gmra.mxu3 %v1678_v40 }
 0x211   :  { %1683 = vtanh.f32 %v917_v41  ;;  %v679_v42 = vpop.f32.mrf.mxu1 }
 0x212   :  { %v1680_v43 = vpop.eup %1679  ;;  %v680_v44 = vadd.f32 %v679_v42, %v2145_v57  ;;  %v439_v45 = vpop.f32.mrf.mxu0 }
 0x213   :  { %v1682_v46 = vpop.eup %1681  ;;  %v440_v47 = vadd.f32 %v439_v45, %v2007_v35  ;;  %966 = vmatmul.f32.gmra.mxu2 %v1680_v43 }
 0x214   :  { %1685 = vtanh.f32 %v680_v44  ;;  %726 = vmatmul.f32.gmra.mxu1 %v1682_v46 }
 0x215   :  { %1687 = vtanh.f32 %v440_v47 }
 0x216   :  { %v919_v48 = vpop.f32.mrf.mxu2 }
 0x217   :  { %v1684_v49 = vpop.eup %1683  ;;  %v920_v50 = vadd.f32 %v919_v48, %v2305_v12 }
 0x218   :  { %1206 = vmatmul.f32.gmra.mxu3 %v1684_v49 }
 0x219   :  { %1689 = vtanh.f32 %v920_v50  ;;  %v682_v51 = vpop.f32.mrf.mxu1 }
 0x21a   :  { %v1686_v52 = vpop.eup %1685  ;;  %v683_v53 = vadd.f32 %v682_v51, %v2145_v57  ;;  %v442_v54 = vpop.f32.mrf.mxu0 }
 0x21b   :  { %v1688_v55 = vpop.eup %1687  ;;  %v443_v56 = vadd.f32 %v442_v54, %v2007_v35  ;;  %969 = vmatmul.f32.gmra.mxu2 %v1686_v52 }
 0x21c   :  { %1691 = vtanh.f32 %v683_v53  ;;  %729 = vmatmul.f32.gmra.mxu1 %v1688_v55 }
 0x21d   :  { %1693 = vtanh.f32 %v443_v56 }
 0x21e   :  { %v922_v59 = vpop.f32.mrf.mxu2 }
 0x21f   :  { %v1690_v60 = vpop.eup %1689  ;;  %v923_v61 = vadd.f32 %v922_v59, %v2305_v12 }
 0x220   :  { %1209 = vmatmul.f32.gmra.mxu3 %v1690_v60 }
 0x221   :  { %1695 = vtanh.f32 %v923_v61  ;;  %v685_v63 = vpop.f32.mrf.mxu1 }
 0x222   :  { %v1692_v0 = vpop.eup %1691  ;;  %v686_v1 = vadd.f32 %v685_v63, %v2145_v57  ;;  %v445_v2 = vpop.f32.mrf.mxu0 }
 0x223   :  { %v1694_v3 = vpop.eup %1693  ;;  %v446_v4 = vadd.f32 %v445_v2, %v2007_v35  ;;  %972 = vmatmul.f32.gmra.mxu2 %v1692_v0  ;;  %v1162_v5 = vpop.f32.mrf.mxu3 }
 0x224   :  { %1697 = vtanh.f32 %v686_v1  ;;  %v1163_v6 = vadd.f32 %v1162_v5, %v2415_v62  ;;  %732 = vmatmul.f32.gmra.mxu1 %v1694_v3 }
 0x225   :  { %1699 = vtanh.f32 %v446_v4 }
 0x226   :  { %1355 = vst.msk [vmem:[%s2826_s2] sm:$0xff] %vm1354_vm1, %v1163_v6  ;;  %v925_v7 = vpop.f32.mrf.mxu2 }
 0x227   :  { %v1696_v8 = vpop.eup %1695  ;;  %v926_v9 = vadd.f32 %v925_v7, %v2305_v12 }
 0x228   :  { %1212 = vmatmul.f32.gmra.mxu3 %v1696_v8 }
 0x229   :  { %1701 = vtanh.f32 %v926_v9  ;;  %v688_v10 = vpop.f32.mrf.mxu1 }
 0x22a   :  { %v1698_v11 = vpop.eup %1697  ;;  %v689_v13 = vadd.f32 %v688_v10, %v2145_v57  ;;  %v448_v14 = vpop.f32.mrf.mxu0 }
 0x22b   :  { %v1700_v15 = vpop.eup %1699  ;;  %v449_v16 = vadd.f32 %v448_v14, %v2007_v35  ;;  %975 = vmatmul.f32.gmra.mxu2 %v1698_v11  ;;  %v1165_v17 = vpop.f32.mrf.mxu3 }
 0x22c   :  { %1703 = vtanh.f32 %v689_v13  ;;  %v1166_v18 = vadd.f32 %v1165_v17, %v2415_v62  ;;  %735 = vmatmul.f32.gmra.mxu1 %v1700_v15 }
 0x22d   :  { %1705 = vtanh.f32 %v449_v16 }
 0x22e   :  { %1356 = vst.msk [vmem:[%s2826_s2 + $0x8] sm:$0xff] %vm1354_vm1, %v1166_v18  ;;  %v928_v19 = vpop.f32.mrf.mxu2 }
 0x22f   :  { %v1702_v20 = vpop.eup %1701  ;;  %v929_v21 = vadd.f32 %v928_v19, %v2305_v12 }
 0x230   :  { %1215 = vmatmul.f32.gmra.mxu3 %v1702_v20 }
 0x231   :  { %1707 = vtanh.f32 %v929_v21  ;;  %v691_v22 = vpop.f32.mrf.mxu1 }
 0x232   :  { %v1704_v23 = vpop.eup %1703  ;;  %v692_v24 = vadd.f32 %v691_v22, %v2145_v57  ;;  %v451_v25 = vpop.f32.mrf.mxu0 }
 0x233   :  { %v1706_v26 = vpop.eup %1705  ;;  %v452_v27 = vadd.f32 %v451_v25, %v2007_v35  ;;  %978 = vmatmul.f32.gmra.mxu2 %v1704_v23  ;;  %v1168_v28 = vpop.f32.mrf.mxu3 }
 0x234   :  { %1709 = vtanh.f32 %v692_v24  ;;  %v1169_v29 = vadd.f32 %v1168_v28, %v2415_v62  ;;  %738 = vmatmul.f32.gmra.mxu1 %v1706_v26 }
 0x235   :  { %1711 = vtanh.f32 %v452_v27 }
 0x236   :  { %1357 = vst.msk [vmem:[%s2826_s2 + $0x10] sm:$0xff] %vm1354_vm1, %v1169_v29  ;;  %v931_v30 = vpop.f32.mrf.mxu2 }
 0x237   :  { %v1708_v31 = vpop.eup %1707  ;;  %v932_v32 = vadd.f32 %v931_v30, %v2305_v12 }
 0x238   :  { %1218 = vmatmul.f32.gmra.mxu3 %v1708_v31 }
 0x239   :  { %1713 = vtanh.f32 %v932_v32  ;;  %v694_v33 = vpop.f32.mrf.mxu1 }
 0x23a   :  { %v1710_v34 = vpop.eup %1709  ;;  %v695_v36 = vadd.f32 %v694_v33, %v2145_v57  ;;  %v454_v37 = vpop.f32.mrf.mxu0 }
 0x23b   :  { %v1712_v38 = vpop.eup %1711  ;;  %v455_v39 = vadd.f32 %v454_v37, %v2007_v35  ;;  %981 = vmatmul.f32.gmra.mxu2 %v1710_v34  ;;  %v1171_v40 = vpop.f32.mrf.mxu3 }
 0x23c   :  { %1715 = vtanh.f32 %v695_v36  ;;  %v1172_v41 = vadd.f32 %v1171_v40, %v2415_v62  ;;  %741 = vmatmul.f32.gmra.mxu1 %v1712_v38 }
 0x23d   :  { %1717 = vtanh.f32 %v455_v39 }
 0x23e   :  { %1358 = vst.msk [vmem:[%s2826_s2 + $0x18] sm:$0xff] %vm1354_vm1, %v1172_v41  ;;  %v934_v42 = vpop.f32.mrf.mxu2 }
 0x23f   :  { %v1714_v43 = vpop.eup %1713  ;;  %v935_v44 = vadd.f32 %v934_v42, %v2305_v12 }
 0x240   :  { %1221 = vmatmul.f32.gmra.mxu3 %v1714_v43 }
 0x241   :  { %1719 = vtanh.f32 %v935_v44  ;;  %v697_v45 = vpop.f32.mrf.mxu1 }
 0x242   :  { %v1716_v46 = vpop.eup %1715  ;;  %v698_v47 = vadd.f32 %v697_v45, %v2145_v57  ;;  %v457_v48 = vpop.f32.mrf.mxu0 }
 0x243   :  { %v1718_v49 = vpop.eup %1717  ;;  %v458_v50 = vadd.f32 %v457_v48, %v2007_v35  ;;  %984 = vmatmul.f32.gmra.mxu2 %v1716_v46  ;;  %v1174_v51 = vpop.f32.mrf.mxu3 }
 0x244   :  { %1721 = vtanh.f32 %v698_v47  ;;  %v1175_v52 = vadd.f32 %v1174_v51, %v2415_v62  ;;  %744 = vmatmul.f32.gmra.mxu1 %v1718_v49 }
 0x245   :  { %1723 = vtanh.f32 %v458_v50 }
 0x246   :  { %1359 = vst.msk [vmem:[%s2826_s2 + $0x20] sm:$0xff] %vm1354_vm1, %v1175_v52  ;;  %v937_v53 = vpop.f32.mrf.mxu2 }
 0x247   :  { %v1720_v54 = vpop.eup %1719  ;;  %v938_v55 = vadd.f32 %v937_v53, %v2305_v12 }
 0x248   :  { %1224 = vmatmul.f32.gmra.mxu3 %v1720_v54 }
 0x249   :  { %1725 = vtanh.f32 %v938_v55  ;;  %v700_v56 = vpop.f32.mrf.mxu1 }
 0x24a   :  { %v1722_v58 = vpop.eup %1721  ;;  %v701_v59 = vadd.f32 %v700_v56, %v2145_v57  ;;  %v460_v60 = vpop.f32.mrf.mxu0 }
 0x24b   :  { %v1724_v61 = vpop.eup %1723  ;;  %v461_v63 = vadd.f32 %v460_v60, %v2007_v35  ;;  %987 = vmatmul.f32.gmra.mxu2 %v1722_v58  ;;  %v1177_v0 = vpop.f32.mrf.mxu3 }
 0x24c   :  { %1727 = vtanh.f32 %v701_v59  ;;  %v1178_v1 = vadd.f32 %v1177_v0, %v2415_v62  ;;  %747 = vmatmul.f32.gmra.mxu1 %v1724_v61 }
 0x24d   :  { %1729 = vtanh.f32 %v461_v63 }
 0x24e   :  { %1360 = vst.msk [vmem:[%s2826_s2 + $0x28] sm:$0xff] %vm1354_vm1, %v1178_v1  ;;  %v940_v2 = vpop.f32.mrf.mxu2 }
 0x24f   :  { %v1726_v3 = vpop.eup %1725  ;;  %v941_v4 = vadd.f32 %v940_v2, %v2305_v12 }
 0x250   :  { %1227 = vmatmul.f32.gmra.mxu3 %v1726_v3 }
 0x251   :  { %1731 = vtanh.f32 %v941_v4  ;;  %v703_v5 = vpop.f32.mrf.mxu1 }
 0x252   :  { %v1728_v6 = vpop.eup %1727  ;;  %v704_v7 = vadd.f32 %v703_v5, %v2145_v57  ;;  %v463_v8 = vpop.f32.mrf.mxu0 }
 0x253   :  { %v1730_v9 = vpop.eup %1729  ;;  %v464_v10 = vadd.f32 %v463_v8, %v2007_v35  ;;  %990 = vmatmul.f32.gmra.mxu2 %v1728_v6  ;;  %v1180_v11 = vpop.f32.mrf.mxu3 }
 0x254   :  { %1733 = vtanh.f32 %v704_v7  ;;  %v1181_v13 = vadd.f32 %v1180_v11, %v2415_v62  ;;  %750 = vmatmul.f32.gmra.mxu1 %v1730_v9 }
 0x255   :  { %1735 = vtanh.f32 %v464_v10 }
 0x256   :  { %1361 = vst.msk [vmem:[%s2826_s2 + $0x30] sm:$0xff] %vm1354_vm1, %v1181_v13  ;;  %v943_v14 = vpop.f32.mrf.mxu2 }
 0x257   :  { %v1732_v15 = vpop.eup %1731  ;;  %v944_v16 = vadd.f32 %v943_v14, %v2305_v12 }
 0x258   :  { %1230 = vmatmul.f32.gmra.mxu3 %v1732_v15 }
 0x259   :  { %1737 = vtanh.f32 %v944_v16  ;;  %v706_v17 = vpop.f32.mrf.mxu1 }
 0x25a   :  { %v1734_v18 = vpop.eup %1733  ;;  %v707_v19 = vadd.f32 %v706_v17, %v2145_v57  ;;  %v466_v20 = vpop.f32.mrf.mxu0 }
 0x25b   :  { %v1736_v21 = vpop.eup %1735  ;;  %v467_v22 = vadd.f32 %v466_v20, %v2007_v35  ;;  %993 = vmatmul.f32.gmra.mxu2 %v1734_v18  ;;  %v1183_v23 = vpop.f32.mrf.mxu3 }
 0x25c   :  { %1739 = vtanh.f32 %v707_v19  ;;  %v1184_v24 = vadd.f32 %v1183_v23, %v2415_v62  ;;  %753 = vmatmul.f32.gmra.mxu1 %v1736_v21 }
 0x25d   :  { %1741 = vtanh.f32 %v467_v22 }
 0x25e   :  { %1362 = vst.msk [vmem:[%s2826_s2 + $0x38] sm:$0xff] %vm1354_vm1, %v1184_v24  ;;  %v946_v25 = vpop.f32.mrf.mxu2 }
 0x25f   :  { %v1738_v26 = vpop.eup %1737  ;;  %v947_v27 = vadd.f32 %v946_v25, %v2305_v12 }
 0x260   :  { %1233 = vmatmul.f32.gmra.mxu3 %v1738_v26 }
 0x261   :  { %1743 = vtanh.f32 %v947_v27  ;;  %v709_v28 = vpop.f32.mrf.mxu1 }
 0x262   :  { %v1740_v29 = vpop.eup %1739  ;;  %v710_v30 = vadd.f32 %v709_v28, %v2145_v57  ;;  %v469_v31 = vpop.f32.mrf.mxu0 }
 0x263   :  { %v1742_v32 = vpop.eup %1741  ;;  %v470_v33 = vadd.f32 %v469_v31, %v2007_v35  ;;  %996 = vmatmul.f32.gmra.mxu2 %v1740_v29  ;;  %v1186_v34 = vpop.f32.mrf.mxu3 }
 0x264   :  { %1745 = vtanh.f32 %v710_v30  ;;  %v1187_v36 = vadd.f32 %v1186_v34, %v2415_v62  ;;  %756 = vmatmul.f32.gmra.mxu1 %v1742_v32 }
 0x265   :  { %1747 = vtanh.f32 %v470_v33 }
 0x266   :  { %1363 = vst.msk [vmem:[%s2826_s2 + $0x40] sm:$0xff] %vm1354_vm1, %v1187_v36  ;;  %v949_v37 = vpop.f32.mrf.mxu2 }
 0x267   :  { %v1744_v38 = vpop.eup %1743  ;;  %v950_v39 = vadd.f32 %v949_v37, %v2305_v12 }
 0x268   :  { %1236 = vmatmul.f32.gmra.mxu3 %v1744_v38 }
 0x269   :  { %1749 = vtanh.f32 %v950_v39  ;;  %v712_v40 = vpop.f32.mrf.mxu1 }
 0x26a   :  { %v1746_v41 = vpop.eup %1745  ;;  %v713_v42 = vadd.f32 %v712_v40, %v2145_v57  ;;  %v472_v43 = vpop.f32.mrf.mxu0 }
 0x26b   :  { %v1748_v44 = vpop.eup %1747  ;;  %v473_v45 = vadd.f32 %v472_v43, %v2007_v35  ;;  %999 = vmatmul.f32.gmra.mxu2 %v1746_v41  ;;  %v1189_v46 = vpop.f32.mrf.mxu3 }
 0x26c   :  { %1751 = vtanh.f32 %v713_v42  ;;  %v1190_v47 = vadd.f32 %v1189_v46, %v2415_v62  ;;  %759 = vmatmul.f32.gmra.mxu1 %v1748_v44 }
 0x26d   :  { %1753 = vtanh.f32 %v473_v45 }
 0x26e   :  { %1364 = vst.msk [vmem:[%s2826_s2 + $0x48] sm:$0xff] %vm1354_vm1, %v1190_v47  ;;  %v952_v48 = vpop.f32.mrf.mxu2 }
 0x26f   :  { %v1750_v49 = vpop.eup %1749  ;;  %v953_v50 = vadd.f32 %v952_v48, %v2305_v12 }
 0x270   :  { %1239 = vmatmul.f32.gmra.mxu3 %v1750_v49 }
 0x271   :  { %1755 = vtanh.f32 %v953_v50  ;;  %v715_v51 = vpop.f32.mrf.mxu1 }
 0x272   :  { %v1752_v52 = vpop.eup %1751  ;;  %v716_v53 = vadd.f32 %v715_v51, %v2145_v57  ;;  %v475_v54 = vpop.f32.mrf.mxu0 }
 0x273   :  { %v1754_v55 = vpop.eup %1753  ;;  %v476_v56 = vadd.f32 %v475_v54, %v2007_v35  ;;  %1002 = vmatmul.f32.gmra.mxu2 %v1752_v52  ;;  %v1192_v58 = vpop.f32.mrf.mxu3 }
 0x274   :  { %1757 = vtanh.f32 %v716_v53  ;;  %v1193_v59 = vadd.f32 %v1192_v58, %v2415_v62  ;;  %762 = vmatmul.f32.gmra.mxu1 %v1754_v55 }
 0x275   :  { %1759 = vtanh.f32 %v476_v56 }
 0x276   :  { %1365 = vst.msk [vmem:[%s2826_s2 + $0x50] sm:$0xff] %vm1354_vm1, %v1193_v59  ;;  %v955_v60 = vpop.f32.mrf.mxu2 }
 0x277   :  { %v1756_v61 = vpop.eup %1755  ;;  %v956_v63 = vadd.f32 %v955_v60, %v2305_v12 }
 0x278   :  { %1242 = vmatmul.f32.gmra.mxu3 %v1756_v61 }
 0x279   :  { %1761 = vtanh.f32 %v956_v63  ;;  %v718_v0 = vpop.f32.mrf.mxu1 }
 0x27a   :  { %v1758_v1 = vpop.eup %1757  ;;  %v719_v2 = vadd.f32 %v718_v0, %v2145_v57  ;;  %v478_v3 = vpop.f32.mrf.mxu0 }
 0x27b   :  { %v1760_v4 = vpop.eup %1759  ;;  %v479_v5 = vadd.f32 %v478_v3, %v2007_v35  ;;  %1005 = vmatmul.f32.gmra.mxu2 %v1758_v1  ;;  %v1195_v6 = vpop.f32.mrf.mxu3 }
 0x27c   :  { %1763 = vtanh.f32 %v719_v2  ;;  %v1196_v7 = vadd.f32 %v1195_v6, %v2415_v62  ;;  %765 = vmatmul.f32.gmra.mxu1 %v1760_v4 }
 0x27d   :  { %1765 = vtanh.f32 %v479_v5 }
 0x27e   :  { %1366 = vst.msk [vmem:[%s2826_s2 + $0x58] sm:$0xff] %vm1354_vm1, %v1196_v7  ;;  %v958_v8 = vpop.f32.mrf.mxu2 }
 0x27f   :  { %v1762_v9 = vpop.eup %1761  ;;  %v959_v10 = vadd.f32 %v958_v8, %v2305_v12 }
 0x280   :  { %1245 = vmatmul.f32.gmra.mxu3 %v1762_v9 }
 0x281   :  { %1767 = vtanh.f32 %v959_v10  ;;  %v721_v11 = vpop.f32.mrf.mxu1 }
 0x282   :  { %v1764_v35 = vpop.eup %1763  ;;  %v722_v13 = vadd.f32 %v721_v11, %v2145_v57 }
 0x283   :  { %v1766_v14 = vpop.eup %1765  ;;  %1008 = vmatmul.f32.gmra.mxu2 %v1764_v35  ;;  %v1198_v15 = vpop.f32.mrf.mxu3 }
 0x284   :  { %1769 = vtanh.f32 %v722_v13  ;;  %v1199_v16 = vadd.f32 %v1198_v15, %v2415_v62  ;;  %768 = vmatmul.f32.gmra.mxu1 %v1766_v14 }
 0x286   :  { %1367 = vst.msk [vmem:[%s2826_s2 + $0x60] sm:$0xff] %vm1354_vm1, %v1199_v16  ;;  %v961_v17 = vpop.f32.mrf.mxu2 }
 0x287   :  { %v1768_v18 = vpop.eup %1767  ;;  %v962_v19 = vadd.f32 %v961_v17, %v2305_v12 }
 0x288   :  { %1248 = vmatmul.f32.gmra.mxu3 %v1768_v18 }
 0x289   :  { %1771 = vtanh.f32 %v962_v19  ;;  %v724_v20 = vpop.f32.mrf.mxu1 }
 0x28a   :  { %v1770_v21 = vpop.eup %1769  ;;  %v725_v22 = vadd.f32 %v724_v20, %v2145_v57 }
 0x28b   :  { %1011 = vmatmul.f32.gmra.mxu2 %v1770_v21  ;;  %v1201_v23 = vpop.f32.mrf.mxu3 }
 0x28c   :  { %1773 = vtanh.f32 %v725_v22  ;;  %v1202_v24 = vadd.f32 %v1201_v23, %v2415_v62 }
 0x28e   :  { %1368 = vst.msk [vmem:[%s2826_s2 + $0x68] sm:$0xff] %vm1354_vm1, %v1202_v24  ;;  %v964_v25 = vpop.f32.mrf.mxu2 }
 0x28f   :  { %v1772_v26 = vpop.eup %1771  ;;  %v965_v27 = vadd.f32 %v964_v25, %v2305_v12 }
 0x290   :  { %1251 = vmatmul.f32.gmra.mxu3 %v1772_v26 }
 0x291   :  { %1775 = vtanh.f32 %v965_v27  ;;  %v727_v28 = vpop.f32.mrf.mxu1 }
 0x292   :  { %v1774_v29 = vpop.eup %1773  ;;  %v728_v30 = vadd.f32 %v727_v28, %v2145_v57 }
 0x293   :  { %1014 = vmatmul.f32.gmra.mxu2 %v1774_v29  ;;  %v1204_v31 = vpop.f32.mrf.mxu3 }
 0x294   :  { %1777 = vtanh.f32 %v728_v30  ;;  %v1205_v32 = vadd.f32 %v1204_v31, %v2415_v62 }
 0x296   :  { %1369 = vst.msk [vmem:[%s2826_s2 + $0x70] sm:$0xff] %vm1354_vm1, %v1205_v32  ;;  %v967_v33 = vpop.f32.mrf.mxu2 }
 0x297   :  { %v1776_v34 = vpop.eup %1775  ;;  %v968_v36 = vadd.f32 %v967_v33, %v2305_v12 }
 0x298   :  { %1254 = vmatmul.f32.gmra.mxu3 %v1776_v34 }
 0x299   :  { %1779 = vtanh.f32 %v968_v36  ;;  %v730_v37 = vpop.f32.mrf.mxu1 }
 0x29a   :  { %v1778_v38 = vpop.eup %1777  ;;  %v731_v39 = vadd.f32 %v730_v37, %v2145_v57 }
 0x29b   :  { %1017 = vmatmul.f32.gmra.mxu2 %v1778_v38  ;;  %v1207_v40 = vpop.f32.mrf.mxu3 }
 0x29c   :  { %1781 = vtanh.f32 %v731_v39  ;;  %v1208_v41 = vadd.f32 %v1207_v40, %v2415_v62 }
 0x29e   :  { %1370 = vst.msk [vmem:[%s2826_s2 + $0x78] sm:$0xff] %vm1354_vm1, %v1208_v41  ;;  %v970_v42 = vpop.f32.mrf.mxu2 }
 0x29f   :  { %v1780_v43 = vpop.eup %1779  ;;  %v971_v44 = vadd.f32 %v970_v42, %v2305_v12 }
 0x2a0   :  { %1257 = vmatmul.f32.gmra.mxu3 %v1780_v43 }
 0x2a1   :  { %1783 = vtanh.f32 %v971_v44  ;;  %v733_v45 = vpop.f32.mrf.mxu1 }
 0x2a2   :  { %v1782_v46 = vpop.eup %1781  ;;  %v734_v47 = vadd.f32 %v733_v45, %v2145_v57 }
 0x2a3   :  { %1020 = vmatmul.f32.gmra.mxu2 %v1782_v46  ;;  %v1210_v48 = vpop.f32.mrf.mxu3 }
 0x2a4   :  { %1785 = vtanh.f32 %v734_v47  ;;  %v1211_v49 = vadd.f32 %v1210_v48, %v2415_v62 }
 0x2a6   :  { %1371 = vst.msk [vmem:[%s2826_s2 + $0x80] sm:$0xff] %vm1354_vm1, %v1211_v49  ;;  %v973_v50 = vpop.f32.mrf.mxu2 }
 0x2a7   :  { %v1784_v51 = vpop.eup %1783  ;;  %v974_v52 = vadd.f32 %v973_v50, %v2305_v12 }
 0x2a8   :  { %1260 = vmatmul.f32.gmra.mxu3 %v1784_v51 }
 0x2a9   :  { %1787 = vtanh.f32 %v974_v52  ;;  %v736_v53 = vpop.f32.mrf.mxu1 }
 0x2aa   :  { %v1786_v54 = vpop.eup %1785  ;;  %v737_v55 = vadd.f32 %v736_v53, %v2145_v57 }
 0x2ab   :  { %1023 = vmatmul.f32.gmra.mxu2 %v1786_v54  ;;  %v1213_v56 = vpop.f32.mrf.mxu3 }
 0x2ac   :  { %1789 = vtanh.f32 %v737_v55  ;;  %v1214_v58 = vadd.f32 %v1213_v56, %v2415_v62 }
 0x2ae   :  { %1372 = vst.msk [vmem:[%s2826_s2 + $0x88] sm:$0xff] %vm1354_vm1, %v1214_v58  ;;  %v976_v59 = vpop.f32.mrf.mxu2 }
 0x2af   :  { %v1788_v60 = vpop.eup %1787  ;;  %v977_v61 = vadd.f32 %v976_v59, %v2305_v12 }
 0x2b0   :  { %1263 = vmatmul.f32.gmra.mxu3 %v1788_v60 }
 0x2b1   :  { %1791 = vtanh.f32 %v977_v61  ;;  %v739_v63 = vpop.f32.mrf.mxu1 }
 0x2b2   :  { %v1790_v0 = vpop.eup %1789  ;;  %v740_v1 = vadd.f32 %v739_v63, %v2145_v57 }
 0x2b3   :  { %1026 = vmatmul.f32.gmra.mxu2 %v1790_v0  ;;  %v1216_v2 = vpop.f32.mrf.mxu3 }
 0x2b4   :  { %1793 = vtanh.f32 %v740_v1  ;;  %v1217_v3 = vadd.f32 %v1216_v2, %v2415_v62 }
 0x2b6   :  { %1373 = vst.msk [vmem:[%s2826_s2 + $0x90] sm:$0xff] %vm1354_vm1, %v1217_v3  ;;  %v979_v4 = vpop.f32.mrf.mxu2 }
 0x2b7   :  { %v1792_v5 = vpop.eup %1791  ;;  %v980_v6 = vadd.f32 %v979_v4, %v2305_v12 }
 0x2b8   :  { %1266 = vmatmul.f32.gmra.mxu3 %v1792_v5 }
 0x2b9   :  { %1795 = vtanh.f32 %v980_v6  ;;  %v742_v7 = vpop.f32.mrf.mxu1 }
 0x2ba   :  { %v1794_v8 = vpop.eup %1793  ;;  %v743_v9 = vadd.f32 %v742_v7, %v2145_v57 }
 0x2bb   :  { %1029 = vmatmul.f32.gmra.mxu2 %v1794_v8  ;;  %v1219_v10 = vpop.f32.mrf.mxu3 }
 0x2bc   :  { %1797 = vtanh.f32 %v743_v9  ;;  %v1220_v11 = vadd.f32 %v1219_v10, %v2415_v62 }
 0x2be   :  { %1374 = vst.msk [vmem:[%s2826_s2 + $0x98] sm:$0xff] %vm1354_vm1, %v1220_v11  ;;  %v982_v35 = vpop.f32.mrf.mxu2 }
 0x2bf   :  { %v1796_v13 = vpop.eup %1795  ;;  %v983_v14 = vadd.f32 %v982_v35, %v2305_v12 }
 0x2c0   :  { %1269 = vmatmul.f32.gmra.mxu3 %v1796_v13 }
 0x2c1   :  { %1799 = vtanh.f32 %v983_v14  ;;  %v745_v15 = vpop.f32.mrf.mxu1 }
 0x2c2   :  { %v1798_v16 = vpop.eup %1797  ;;  %v746_v17 = vadd.f32 %v745_v15, %v2145_v57 }
 0x2c3   :  { %1032 = vmatmul.f32.gmra.mxu2 %v1798_v16  ;;  %v1222_v18 = vpop.f32.mrf.mxu3 }
 0x2c4   :  { %1801 = vtanh.f32 %v746_v17  ;;  %v1223_v19 = vadd.f32 %v1222_v18, %v2415_v62 }
 0x2c6   :  { %1375 = vst.msk [vmem:[%s2826_s2 + $0xa0] sm:$0xff] %vm1354_vm1, %v1223_v19  ;;  %v985_v20 = vpop.f32.mrf.mxu2 }
 0x2c7   :  { %v1800_v21 = vpop.eup %1799  ;;  %v986_v22 = vadd.f32 %v985_v20, %v2305_v12 }
 0x2c8   :  { %1272 = vmatmul.f32.gmra.mxu3 %v1800_v21 }
 0x2c9   :  { %1803 = vtanh.f32 %v986_v22  ;;  %v748_v23 = vpop.f32.mrf.mxu1 }
 0x2ca   :  { %v1802_v24 = vpop.eup %1801  ;;  %v749_v25 = vadd.f32 %v748_v23, %v2145_v57 }
 0x2cb   :  { %1035 = vmatmul.f32.gmra.mxu2 %v1802_v24  ;;  %v1225_v26 = vpop.f32.mrf.mxu3 }
 0x2cc   :  { %1805 = vtanh.f32 %v749_v25  ;;  %v1226_v27 = vadd.f32 %v1225_v26, %v2415_v62 }
 0x2ce   :  { %1376 = vst.msk [vmem:[%s2826_s2 + $0xa8] sm:$0xff] %vm1354_vm1, %v1226_v27  ;;  %v988_v28 = vpop.f32.mrf.mxu2 }
 0x2cf   :  { %v1804_v29 = vpop.eup %1803  ;;  %v989_v30 = vadd.f32 %v988_v28, %v2305_v12 }
 0x2d0   :  { %1275 = vmatmul.f32.gmra.mxu3 %v1804_v29 }
 0x2d1   :  { %1807 = vtanh.f32 %v989_v30  ;;  %v751_v31 = vpop.f32.mrf.mxu1 }
 0x2d2   :  { %v1806_v32 = vpop.eup %1805  ;;  %v752_v33 = vadd.f32 %v751_v31, %v2145_v57 }
 0x2d3   :  { %1038 = vmatmul.f32.gmra.mxu2 %v1806_v32  ;;  %v1228_v34 = vpop.f32.mrf.mxu3 }
 0x2d4   :  { %1809 = vtanh.f32 %v752_v33  ;;  %v1229_v36 = vadd.f32 %v1228_v34, %v2415_v62 }
 0x2d6   :  { %1377 = vst.msk [vmem:[%s2826_s2 + $0xb0] sm:$0xff] %vm1354_vm1, %v1229_v36  ;;  %v991_v37 = vpop.f32.mrf.mxu2 }
 0x2d7   :  { %v1808_v38 = vpop.eup %1807  ;;  %v992_v39 = vadd.f32 %v991_v37, %v2305_v12 }
 0x2d8   :  { %1278 = vmatmul.f32.gmra.mxu3 %v1808_v38 }
 0x2d9   :  { %1811 = vtanh.f32 %v992_v39  ;;  %v754_v40 = vpop.f32.mrf.mxu1 }
 0x2da   :  { %v1810_v41 = vpop.eup %1809  ;;  %v755_v42 = vadd.f32 %v754_v40, %v2145_v57 }
 0x2db   :  { %1041 = vmatmul.f32.gmra.mxu2 %v1810_v41  ;;  %v1231_v43 = vpop.f32.mrf.mxu3 }
 0x2dc   :  { %1813 = vtanh.f32 %v755_v42  ;;  %v1232_v44 = vadd.f32 %v1231_v43, %v2415_v62 }
 0x2de   :  { %1378 = vst.msk [vmem:[%s2826_s2 + $0xb8] sm:$0xff] %vm1354_vm1, %v1232_v44  ;;  %v994_v45 = vpop.f32.mrf.mxu2 }
 0x2df   :  { %v1812_v46 = vpop.eup %1811  ;;  %v995_v47 = vadd.f32 %v994_v45, %v2305_v12 }
 0x2e0   :  { %1281 = vmatmul.f32.gmra.mxu3 %v1812_v46 }
 0x2e1   :  { %1815 = vtanh.f32 %v995_v47  ;;  %v757_v48 = vpop.f32.mrf.mxu1 }
 0x2e2   :  { %v1814_v49 = vpop.eup %1813  ;;  %v758_v50 = vadd.f32 %v757_v48, %v2145_v57 }
 0x2e3   :  { %1044 = vmatmul.f32.gmra.mxu2 %v1814_v49  ;;  %v1234_v51 = vpop.f32.mrf.mxu3 }
 0x2e4   :  { %1817 = vtanh.f32 %v758_v50  ;;  %v1235_v52 = vadd.f32 %v1234_v51, %v2415_v62 }
 0x2e6   :  { %1379 = vst.msk [vmem:[%s2826_s2 + $0xc0] sm:$0xff] %vm1354_vm1, %v1235_v52  ;;  %v997_v53 = vpop.f32.mrf.mxu2 }
 0x2e7   :  { %v1816_v54 = vpop.eup %1815  ;;  %v998_v55 = vadd.f32 %v997_v53, %v2305_v12 }
 0x2e8   :  { %1284 = vmatmul.f32.gmra.mxu3 %v1816_v54 }
 0x2e9   :  { %1819 = vtanh.f32 %v998_v55  ;;  %v760_v56 = vpop.f32.mrf.mxu1 }
 0x2ea   :  { %v1818_v58 = vpop.eup %1817  ;;  %v761_v59 = vadd.f32 %v760_v56, %v2145_v57 }
 0x2eb   :  { %1047 = vmatmul.f32.gmra.mxu2 %v1818_v58  ;;  %v1237_v60 = vpop.f32.mrf.mxu3 }
 0x2ec   :  { %1821 = vtanh.f32 %v761_v59  ;;  %v1238_v61 = vadd.f32 %v1237_v60, %v2415_v62 }
 0x2ee   :  { %1380 = vst.msk [vmem:[%s2826_s2 + $0xc8] sm:$0xff] %vm1354_vm1, %v1238_v61  ;;  %v1000_v63 = vpop.f32.mrf.mxu2 }
 0x2ef   :  { %v1820_v0 = vpop.eup %1819  ;;  %v1001_v1 = vadd.f32 %v1000_v63, %v2305_v12 }
 0x2f0   :  { %1287 = vmatmul.f32.gmra.mxu3 %v1820_v0 }
 0x2f1   :  { %1823 = vtanh.f32 %v1001_v1  ;;  %v763_v2 = vpop.f32.mrf.mxu1 }
 0x2f2   :  { %v1822_v3 = vpop.eup %1821  ;;  %v764_v4 = vadd.f32 %v763_v2, %v2145_v57 }
 0x2f3   :  { %1050 = vmatmul.f32.gmra.mxu2 %v1822_v3  ;;  %v1240_v5 = vpop.f32.mrf.mxu3 }
 0x2f4   :  { %1825 = vtanh.f32 %v764_v4  ;;  %v1241_v6 = vadd.f32 %v1240_v5, %v2415_v62 }
 0x2f6   :  { %1381 = vst.msk [vmem:[%s2826_s2 + $0xd0] sm:$0xff] %vm1354_vm1, %v1241_v6  ;;  %v1003_v7 = vpop.f32.mrf.mxu2 }
 0x2f7   :  { %v1824_v8 = vpop.eup %1823  ;;  %v1004_v9 = vadd.f32 %v1003_v7, %v2305_v12 }
 0x2f8   :  { %1290 = vmatmul.f32.gmra.mxu3 %v1824_v8 }
 0x2f9   :  { %1827 = vtanh.f32 %v1004_v9  ;;  %v766_v10 = vpop.f32.mrf.mxu1 }
 0x2fa   :  { %v1826_v11 = vpop.eup %1825  ;;  %v767_v35 = vadd.f32 %v766_v10, %v2145_v57 }
 0x2fb   :  { %1053 = vmatmul.f32.gmra.mxu2 %v1826_v11  ;;  %v1243_v13 = vpop.f32.mrf.mxu3 }
 0x2fc   :  { %1829 = vtanh.f32 %v767_v35  ;;  %v1244_v14 = vadd.f32 %v1243_v13, %v2415_v62 }
 0x2fe   :  { %1382 = vst.msk [vmem:[%s2826_s2 + $0xd8] sm:$0xff] %vm1354_vm1, %v1244_v14  ;;  %v1006_v15 = vpop.f32.mrf.mxu2 }
 0x2ff   :  { %v1828_v16 = vpop.eup %1827  ;;  %v1007_v17 = vadd.f32 %v1006_v15, %v2305_v12 }
 0x300   :  { %1293 = vmatmul.f32.gmra.mxu3 %v1828_v16 }
 0x301   :  { %1831 = vtanh.f32 %v1007_v17  ;;  %v769_v18 = vpop.f32.mrf.mxu1 }
 0x302   :  { %v1830_v19 = vpop.eup %1829  ;;  %v770_v20 = vadd.f32 %v769_v18, %v2145_v57 }
 0x303   :  { %1056 = vmatmul.f32.gmra.mxu2 %v1830_v19  ;;  %v1246_v21 = vpop.f32.mrf.mxu3 }
 0x304   :  { %1833 = vtanh.f32 %v770_v20  ;;  %v1247_v22 = vadd.f32 %v1246_v21, %v2415_v62 }
 0x306   :  { %1383 = vst.msk [vmem:[%s2826_s2 + $0xe0] sm:$0xff] %vm1354_vm1, %v1247_v22  ;;  %v1009_v23 = vpop.f32.mrf.mxu2 }
 0x307   :  { %v1832_v24 = vpop.eup %1831  ;;  %v1010_v25 = vadd.f32 %v1009_v23, %v2305_v12 }
 0x308   :  { %1296 = vmatmul.f32.gmra.mxu3 %v1832_v24 }
 0x309   :  { %1835 = vtanh.f32 %v1010_v25 }
 0x30a   :  { %v1834_v26 = vpop.eup %1833 }
 0x30b   :  { %1059 = vmatmul.f32.gmra.mxu2 %v1834_v26  ;;  %v1249_v27 = vpop.f32.mrf.mxu3 }
 0x30c   :  { %v1250_v57 = vadd.f32 %v1249_v27, %v2415_v62 }
 0x30e   :  { %1384 = vst.msk [vmem:[%s2826_s2 + $0xe8] sm:$0xff] %vm1354_vm1, %v1250_v57  ;;  %v1012_v28 = vpop.f32.mrf.mxu2 }
 0x30f   :  { %v1836_v29 = vpop.eup %1835  ;;  %v1013_v30 = vadd.f32 %v1012_v28, %v2305_v12 }
 0x310   :  { %1299 = vmatmul.f32.gmra.mxu3 %v1836_v29 }
 0x311   :  { %1837 = vtanh.f32 %v1013_v30 }
 0x313   :  { %v1252_v31 = vpop.f32.mrf.mxu3 }
 0x314   :  { %v1253_v32 = vadd.f32 %v1252_v31, %v2415_v62 }
 0x316   :  { %1385 = vst.msk [vmem:[%s2826_s2 + $0xf0] sm:$0xff] %vm1354_vm1, %v1253_v32  ;;  %v1015_v33 = vpop.f32.mrf.mxu2 }
 0x317   :  { %v1838_v34 = vpop.eup %1837  ;;  %v1016_v36 = vadd.f32 %v1015_v33, %v2305_v12 }
 0x318   :  { %1302 = vmatmul.f32.gmra.mxu3 %v1838_v34 }
 0x319   :  { %1839 = vtanh.f32 %v1016_v36 }
 0x31b   :  { %v1255_v37 = vpop.f32.mrf.mxu3 }
 0x31c   :  { %v1256_v38 = vadd.f32 %v1255_v37, %v2415_v62 }
 0x31e   :  { %1386 = vst.msk [vmem:[%s2826_s2 + $0xf8] sm:$0xff] %vm1354_vm1, %v1256_v38  ;;  %v1018_v39 = vpop.f32.mrf.mxu2 }
 0x31f   :  { %v1840_v40 = vpop.eup %1839  ;;  %v1019_v41 = vadd.f32 %v1018_v39, %v2305_v12 }
 0x320   :  { %1305 = vmatmul.f32.gmra.mxu3 %v1840_v40 }
 0x321   :  { %1841 = vtanh.f32 %v1019_v41 }
 0x323   :  { %v1258_v42 = vpop.f32.mrf.mxu3 }
 0x324   :  { %v1259_v43 = vadd.f32 %v1258_v42, %v2415_v62 }
 0x326   :  { %1387 = vst.msk [vmem:[%s2826_s2 + $0x100] sm:$0xff] %vm1354_vm1, %v1259_v43  ;;  %v1021_v44 = vpop.f32.mrf.mxu2 }
 0x327   :  { %v1842_v45 = vpop.eup %1841  ;;  %v1022_v46 = vadd.f32 %v1021_v44, %v2305_v12 }
 0x328   :  { %1308 = vmatmul.f32.gmra.mxu3 %v1842_v45 }
 0x329   :  { %1843 = vtanh.f32 %v1022_v46 }
 0x32b   :  { %v1261_v47 = vpop.f32.mrf.mxu3 }
 0x32c   :  { %v1262_v48 = vadd.f32 %v1261_v47, %v2415_v62 }
 0x32e   :  { %1388 = vst.msk [vmem:[%s2826_s2 + $0x108] sm:$0xff] %vm1354_vm1, %v1262_v48  ;;  %v1024_v49 = vpop.f32.mrf.mxu2 }
 0x32f   :  { %v1844_v50 = vpop.eup %1843  ;;  %v1025_v51 = vadd.f32 %v1024_v49, %v2305_v12 }
 0x330   :  { %1311 = vmatmul.f32.gmra.mxu3 %v1844_v50 }
 0x331   :  { %1845 = vtanh.f32 %v1025_v51 }
 0x333   :  { %v1264_v52 = vpop.f32.mrf.mxu3 }
 0x334   :  { %v1265_v53 = vadd.f32 %v1264_v52, %v2415_v62 }
 0x336   :  { %1389 = vst.msk [vmem:[%s2826_s2 + $0x110] sm:$0xff] %vm1354_vm1, %v1265_v53  ;;  %v1027_v54 = vpop.f32.mrf.mxu2 }
 0x337   :  { %v1846_v55 = vpop.eup %1845  ;;  %v1028_v56 = vadd.f32 %v1027_v54, %v2305_v12 }
 0x338   :  { %1314 = vmatmul.f32.gmra.mxu3 %v1846_v55 }
 0x339   :  { %1847 = vtanh.f32 %v1028_v56 }
 0x33b   :  { %v1267_v58 = vpop.f32.mrf.mxu3 }
 0x33c   :  { %v1268_v59 = vadd.f32 %v1267_v58, %v2415_v62 }
 0x33e   :  { %1390 = vst.msk [vmem:[%s2826_s2 + $0x118] sm:$0xff] %vm1354_vm1, %v1268_v59  ;;  %v1030_v60 = vpop.f32.mrf.mxu2 }
 0x33f   :  { %v1848_v61 = vpop.eup %1847  ;;  %v1031_v63 = vadd.f32 %v1030_v60, %v2305_v12 }
 0x340   :  { %1317 = vmatmul.f32.gmra.mxu3 %v1848_v61 }
 0x341   :  { %1849 = vtanh.f32 %v1031_v63 }
 0x343   :  { %v1270_v0 = vpop.f32.mrf.mxu3 }
 0x344   :  { %v1271_v1 = vadd.f32 %v1270_v0, %v2415_v62 }
 0x346   :  { %1391 = vst.msk [vmem:[%s2826_s2 + $0x120] sm:$0xff] %vm1354_vm1, %v1271_v1  ;;  %v1033_v2 = vpop.f32.mrf.mxu2 }
 0x347   :  { %v1850_v3 = vpop.eup %1849  ;;  %v1034_v4 = vadd.f32 %v1033_v2, %v2305_v12 }
 0x348   :  { %1320 = vmatmul.f32.gmra.mxu3 %v1850_v3 }
 0x349   :  { %1851 = vtanh.f32 %v1034_v4 }
 0x34b   :  { %v1273_v5 = vpop.f32.mrf.mxu3 }
 0x34c   :  { %v1274_v6 = vadd.f32 %v1273_v5, %v2415_v62 }
 0x34e   :  { %1392 = vst.msk [vmem:[%s2826_s2 + $0x128] sm:$0xff] %vm1354_vm1, %v1274_v6  ;;  %v1036_v7 = vpop.f32.mrf.mxu2 }
 0x34f   :  { %v1852_v8 = vpop.eup %1851  ;;  %v1037_v9 = vadd.f32 %v1036_v7, %v2305_v12 }
 0x350   :  { %1323 = vmatmul.f32.gmra.mxu3 %v1852_v8 }
 0x351   :  { %1853 = vtanh.f32 %v1037_v9 }
 0x353   :  { %v1276_v10 = vpop.f32.mrf.mxu3 }
 0x354   :  { %v1277_v11 = vadd.f32 %v1276_v10, %v2415_v62 }
 0x356   :  { %1393 = vst.msk [vmem:[%s2826_s2 + $0x130] sm:$0xff] %vm1354_vm1, %v1277_v11  ;;  %v1039_v35 = vpop.f32.mrf.mxu2 }
 0x357   :  { %v1854_v13 = vpop.eup %1853  ;;  %v1040_v14 = vadd.f32 %v1039_v35, %v2305_v12 }
 0x358   :  { %1326 = vmatmul.f32.gmra.mxu3 %v1854_v13 }
 0x359   :  { %1855 = vtanh.f32 %v1040_v14 }
 0x35b   :  { %v1279_v15 = vpop.f32.mrf.mxu3 }
 0x35c   :  { %v1280_v16 = vadd.f32 %v1279_v15, %v2415_v62 }
 0x35e   :  { %1394 = vst.msk [vmem:[%s2826_s2 + $0x138] sm:$0xff] %vm1354_vm1, %v1280_v16  ;;  %v1042_v17 = vpop.f32.mrf.mxu2 }
 0x35f   :  { %v1856_v18 = vpop.eup %1855  ;;  %v1043_v19 = vadd.f32 %v1042_v17, %v2305_v12 }
 0x360   :  { %1329 = vmatmul.f32.gmra.mxu3 %v1856_v18 }
 0x361   :  { %1857 = vtanh.f32 %v1043_v19 }
 0x363   :  { %v1282_v20 = vpop.f32.mrf.mxu3 }
 0x364   :  { %v1283_v21 = vadd.f32 %v1282_v20, %v2415_v62 }
 0x366   :  { %1395 = vst.msk [vmem:[%s2826_s2 + $0x140] sm:$0xff] %vm1354_vm1, %v1283_v21  ;;  %v1045_v22 = vpop.f32.mrf.mxu2 }
 0x367   :  { %v1858_v23 = vpop.eup %1857  ;;  %v1046_v24 = vadd.f32 %v1045_v22, %v2305_v12 }
 0x368   :  { %1332 = vmatmul.f32.gmra.mxu3 %v1858_v23 }
 0x369   :  { %1859 = vtanh.f32 %v1046_v24 }
 0x36b   :  { %v1285_v25 = vpop.f32.mrf.mxu3 }
 0x36c   :  { %v1286_v26 = vadd.f32 %v1285_v25, %v2415_v62 }
 0x36e   :  { %1396 = vst.msk [vmem:[%s2826_s2 + $0x148] sm:$0xff] %vm1354_vm1, %v1286_v26  ;;  %v1048_v27 = vpop.f32.mrf.mxu2 }
 0x36f   :  { %v1860_v57 = vpop.eup %1859  ;;  %v1049_v28 = vadd.f32 %v1048_v27, %v2305_v12 }
 0x370   :  { %1335 = vmatmul.f32.gmra.mxu3 %v1860_v57 }
 0x371   :  { %1861 = vtanh.f32 %v1049_v28 }
 0x373   :  { %v1288_v29 = vpop.f32.mrf.mxu3 }
 0x374   :  { %v1289_v30 = vadd.f32 %v1288_v29, %v2415_v62 }
 0x376   :  { %1397 = vst.msk [vmem:[%s2826_s2 + $0x150] sm:$0xff] %vm1354_vm1, %v1289_v30  ;;  %v1051_v31 = vpop.f32.mrf.mxu2 }
 0x377   :  { %v1862_v32 = vpop.eup %1861  ;;  %v1052_v33 = vadd.f32 %v1051_v31, %v2305_v12 }
 0x378   :  { %1338 = vmatmul.f32.gmra.mxu3 %v1862_v32 }
 0x379   :  { %1863 = vtanh.f32 %v1052_v33 }
 0x37b   :  { %v1291_v34 = vpop.f32.mrf.mxu3 }
 0x37c   :  { %v1292_v36 = vadd.f32 %v1291_v34, %v2415_v62 }
 0x37e   :  { %1398 = vst.msk [vmem:[%s2826_s2 + $0x158] sm:$0xff] %vm1354_vm1, %v1292_v36  ;;  %v1054_v37 = vpop.f32.mrf.mxu2 }
 0x37f   :  { %v1864_v38 = vpop.eup %1863  ;;  %v1055_v39 = vadd.f32 %v1054_v37, %v2305_v12 }
 0x380   :  { %1341 = vmatmul.f32.gmra.mxu3 %v1864_v38 }
 0x381   :  { %1865 = vtanh.f32 %v1055_v39 }
 0x383   :  { %v1294_v40 = vpop.f32.mrf.mxu3 }
 0x384   :  { %v1295_v41 = vadd.f32 %v1294_v40, %v2415_v62 }
 0x386   :  { %1399 = vst.msk [vmem:[%s2826_s2 + $0x160] sm:$0xff] %vm1354_vm1, %v1295_v41  ;;  %v1057_v42 = vpop.f32.mrf.mxu2 }
 0x387   :  { %v1866_v43 = vpop.eup %1865  ;;  %v1058_v44 = vadd.f32 %v1057_v42, %v2305_v12 }
 0x388   :  { %1344 = vmatmul.f32.gmra.mxu3 %v1866_v43 }
 0x389   :  { %1867 = vtanh.f32 %v1058_v44 }
 0x38b   :  { %v1297_v45 = vpop.f32.mrf.mxu3 }
 0x38c   :  { %v1298_v46 = vadd.f32 %v1297_v45, %v2415_v62 }
 0x38e   :  { %1400 = vst.msk [vmem:[%s2826_s2 + $0x168] sm:$0xff] %vm1354_vm1, %v1298_v46  ;;  %v1060_v47 = vpop.f32.mrf.mxu2 }
 0x38f   :  { %v1868_v48 = vpop.eup %1867  ;;  %v1061_v49 = vadd.f32 %v1060_v47, %v2305_v12 }
 0x390   :  { %1347 = vmatmul.f32.gmra.mxu3 %v1868_v48 }
 0x391   :  { %1869 = vtanh.f32 %v1061_v49 }
 0x393   :  { %v1300_v50 = vpop.f32.mrf.mxu3 }
 0x394   :  { %v1301_v51 = vadd.f32 %v1300_v50, %v2415_v62 }
 0x396   :  { %1401 = vst.msk [vmem:[%s2826_s2 + $0x170] sm:$0xff] %vm1354_vm1, %v1301_v51 }
 0x397   :  { %v1870_v52 = vpop.eup %1869 }
 0x398   :  { %1350 = vmatmul.f32.gmra.mxu3 %v1870_v52 }
 0x39b   :  { %v1303_v53 = vpop.f32.mrf.mxu3 }
 0x39c   :  { %v1304_v54 = vadd.f32 %v1303_v53, %v2415_v62 }
 0x39e   :  { %1402 = vst.msk [vmem:[%s2826_s2 + $0x178] sm:$0xff] %vm1354_vm1, %v1304_v54 }
 0x3a3   :  { %v1306_v12 = vpop.f32.mrf.mxu3 }
 0x3a4   :  { %v1307_v55 = vadd.f32 %v1306_v12, %v2415_v62 }
 0x3a6   :  { %1403 = vst.msk [vmem:[%s2826_s2 + $0x180] sm:$0xff] %vm1354_vm1, %v1307_v55 }
 0x3ab   :  { %v1309_v56 = vpop.f32.mrf.mxu3 }
 0x3ac   :  { %v1310_v58 = vadd.f32 %v1309_v56, %v2415_v62 }
 0x3ae   :  { %1404 = vst.msk [vmem:[%s2826_s2 + $0x188] sm:$0xff] %vm1354_vm1, %v1310_v58 }
 0x3b3   :  { %v1312_v59 = vpop.f32.mrf.mxu3 }
 0x3b4   :  { %v1313_v60 = vadd.f32 %v1312_v59, %v2415_v62 }
 0x3b6   :  { %1405 = vst.msk [vmem:[%s2826_s2 + $0x190] sm:$0xff] %vm1354_vm1, %v1313_v60 }
 0x3bb   :  { %v1315_v61 = vpop.f32.mrf.mxu3 }
 0x3bc   :  { %v1316_v63 = vadd.f32 %v1315_v61, %v2415_v62 }
 0x3be   :  { %1406 = vst.msk [vmem:[%s2826_s2 + $0x198] sm:$0xff] %vm1354_vm1, %v1316_v63 }
 0x3c3   :  { %v1318_v0 = vpop.f32.mrf.mxu3 }
 0x3c4   :  { %v1319_v1 = vadd.f32 %v1318_v0, %v2415_v62 }
 0x3c6   :  { %1407 = vst.msk [vmem:[%s2826_s2 + $0x1a0] sm:$0xff] %vm1354_vm1, %v1319_v1 }
 0x3cb   :  { %v1321_v2 = vpop.f32.mrf.mxu3 }
 0x3cc   :  { %v1322_v3 = vadd.f32 %v1321_v2, %v2415_v62 }
 0x3ce   :  { %1408 = vst.msk [vmem:[%s2826_s2 + $0x1a8] sm:$0xff] %vm1354_vm1, %v1322_v3 }
 0x3d3   :  { %v1324_v4 = vpop.f32.mrf.mxu3 }
 0x3d4   :  { %v1325_v5 = vadd.f32 %v1324_v4, %v2415_v62 }
 0x3d6   :  { %1409 = vst.msk [vmem:[%s2826_s2 + $0x1b0] sm:$0xff] %vm1354_vm1, %v1325_v5 }
 0x3db   :  { %v1327_v6 = vpop.f32.mrf.mxu3 }
 0x3dc   :  { %v1328_v7 = vadd.f32 %v1327_v6, %v2415_v62 }
 0x3de   :  { %1410 = vst.msk [vmem:[%s2826_s2 + $0x1b8] sm:$0xff] %vm1354_vm1, %v1328_v7 }
 0x3e3   :  { %v1330_v8 = vpop.f32.mrf.mxu3 }
 0x3e4   :  { %v1331_v9 = vadd.f32 %v1330_v8, %v2415_v62 }
 0x3e6   :  { %1411 = vst.msk [vmem:[%s2826_s2 + $0x1c0] sm:$0xff] %vm1354_vm1, %v1331_v9 }
 0x3eb   :  { %v1333_v10 = vpop.f32.mrf.mxu3 }
 0x3ec   :  { %v1334_v11 = vadd.f32 %v1333_v10, %v2415_v62 }
 0x3ee   :  { %1412 = vst.msk [vmem:[%s2826_s2 + $0x1c8] sm:$0xff] %vm1354_vm1, %v1334_v11 }
 0x3f3   :  { %v1336_v35 = vpop.f32.mrf.mxu3 }
 0x3f4   :  { %v1337_v13 = vadd.f32 %v1336_v35, %v2415_v62 }
 0x3f6   :  { %1413 = vst.msk [vmem:[%s2826_s2 + $0x1d0] sm:$0xff] %vm1354_vm1, %v1337_v13 }
 0x3fb   :  { %v1339_v14 = vpop.f32.mrf.mxu3 }
 0x3fc   :  { %v1340_v15 = vadd.f32 %v1339_v14, %v2415_v62 }
 0x3fe   :  { %1414 = vst.msk [vmem:[%s2826_s2 + $0x1d8] sm:$0xff] %vm1354_vm1, %v1340_v15 }
 0x403   :  { %v1342_v16 = vpop.f32.mrf.mxu3 }
 0x404   :  { %v1343_v17 = vadd.f32 %v1342_v16, %v2415_v62 }
 0x406   :  { %1415 = vst.msk [vmem:[%s2826_s2 + $0x1e0] sm:$0xff] %vm1354_vm1, %v1343_v17 }
 0x40b   :  { %v1345_v18 = vpop.f32.mrf.mxu3 }
 0x40c   :  { %v1346_v19 = vadd.f32 %v1345_v18, %v2415_v62 }
 0x40e   :  { %1416 = vst.msk [vmem:[%s2826_s2 + $0x1e8] sm:$0xff] %vm1354_vm1, %v1346_v19 }
 0x413   :  { %v1348_v20 = vpop.f32.mrf.mxu3 }
 0x414   :  { %v1349_v21 = vadd.f32 %v1348_v20, %v2415_v62 }
 0x416   :  { %1417 = vst.msk [vmem:[%s2826_s2 + $0x1f0] sm:$0xff] %vm1354_vm1, %v1349_v21 }
 0x41b   :  { %v1351_v22 = vpop.f32.mrf.mxu3 }
 0x41c   :  { %v1352_v23 = vadd.f32 %v1351_v22, %v2415_v62 }
 0x41e   :  { %1418 = vst.msk [vmem:[%s2826_s2 + $0x1f8] sm:$0xff] %vm1354_vm1, %v1352_v23 }

</bundles_post_ra>
